<compile_context>
chip_gen: v5e
topology: v5e:2x2
jax: 0.10.0
libtpu: 0.0.40
codegen_flags: <defaults>
</compile_context>

<pallas_src>
import numpy as np
import jax
import jax.numpy as jnp
from jax.experimental import pallas as pl
from jax.experimental.pallas import tpu as pltpu


def _round_up(x, m):
    return -(-x // m) * m


# -----------------------------------------------------------------------------
# Host-side constant builders (tiny, numpy)
# -----------------------------------------------------------------------------
def _halo_mask(H, W, p_pad):
    """(1, p_pad) mask: 1 at valid interior positions p = (i+1)*(W+2)+(j+1),
    0 on halo / garbage / slack lanes."""
    Wp = W + 2
    m = np.zeros((1, p_pad), np.float32)
    for i in range(H):
        m[0, (i + 1) * Wp + 1:(i + 1) * Wp + 1 + W] = 1.0
    return m


def _pool_reloc_mat(H, W, p_pad_in, p_pad_out):
    """Single relocation matrix for the 2x2/stride-2 max-pool epilogue.

    The 2x2 max itself is done with rolls + maximum; this matrix only picks
    the even (i, j) columns of the conv shifted-flat frame (row stride W+2)
    and drops them into the half-resolution *padded* frame (row stride
    W//2 + 2), leaving halo / slack lanes exactly zero."""
    Wp, Wq = W + 2, W // 2 + 2
    S = np.zeros((p_pad_in, p_pad_out), np.float32)
    for i2 in range(H // 2):
        for j2 in range(W // 2):
            S[(2 * i2) * Wp + 2 * j2, (i2 + 1) * Wq + (j2 + 1)] = 1.0
    return S


def _pack_weight(w, cin_pad):
    """(Cout, Cin, 3, 3) f32 -> bf16 (Cout, 9*cin_pad) matching the im2col
    slab row order (tap-major t = 3*ky+kx, channel-minor)."""
    cout, cin = w.shape[0], w.shape[1]
    wp = jnp.pad(w, ((0, 0), (0, cin_pad - cin), (0, 0), (0, 0)))
    wp = jnp.transpose(wp, (0, 2, 3, 1)).reshape(cout, 9 * cin_pad)
    return wp.astype(jnp.bfloat16)


def _full_spec(a):
    nd = a.ndim
    return pl.BlockSpec(a.shape, lambda n, nd=nd: (0,) * nd)


# -----------------------------------------------------------------------------
# Fused Pallas kernel: features[0..11] for B_TILE samples per grid step
# -----------------------------------------------------------------------------
def _make_fused_kernel(H, W, cin_pad, widths, b_tile, p_pads):
    c1, c2, c3, c4, c5 = widths
    Wp0, Wp1, Wp2 = W + 2, W // 2 + 2, W // 4 + 2
    P0p, P1p, P2p = p_pads

    def conv_relu(slab, act, cin, Wp, Pp, w_ref, b_ref):
        # im2col slab in VMEM: 9 lane-rolled copies of the padded activation
        # (channels on sublanes, flattened spatial on lanes).  One bf16 MXU
        # matmul with K = 9*cin and N = Pp (lane-dense); f32 acc + bias + ReLU.
        for ky in range(3):
            for kx in range(3):
                t = 3 * ky + kx
                off = ky * Wp + kx
                shifted = act if off == 0 else pltpu.roll(act, Pp - off, axis=1)
                slab[t * cin:(t + 1) * cin, 0:Pp] = shifted
        rhs = slab[0:9 * cin, 0:Pp].astype(jnp.bfloat16)
        acc = jnp.dot(w_ref[...], rhs, preferred_element_type=jnp.float32)
        return jnp.maximum(acc + b_ref[...], 0.0)

    def pool2x2(y, Wp, s_ref):
        # 2x2/stride-2 max via rolls (XLU) + maximum (VPU); then ONE small
        # selection matmul relocates the even columns into the next padded
        # layout (halo / slack lanes come out exactly zero).
        Pp = y.shape[1]
        h = jnp.maximum(y, pltpu.roll(y, Pp - 1, axis=1))
        v = jnp.maximum(h, pltpu.roll(h, Pp - Wp, axis=1))
        return jnp.dot(v, s_ref[...], preferred_element_type=jnp.float32)

    def kernel(x_ref, w1, b1, w2, b2, w3, b3, w4, b4, w5, b5,
               m0, m1, s1, s2, o_ref, abuf, slab):
        for s in range(b_tile):                       # samples per grid step
            x0 = x_ref[s]                             # (cin_pad, P0p), padded
            # features[0..1]: conv + ReLU                          (H x W)
            y = conv_relu(slab, x0, cin_pad, Wp0, P0p, w1, b1)
            abuf[0:c1, 0:P0p] = pltpu.roll(y, Wp0 + 1, axis=1) * m0[...]
            # features[2..4]: conv + ReLU + maxpool                (-> H/2 x W/2)
            y = conv_relu(slab, abuf[0:c1, 0:P0p], c1, Wp0, P0p, w2, b2)
            abuf[0:c2, 0:P1p] = pool2x2(y, Wp0, s1)
            # features[5..6]: conv + ReLU                          (H/2 x W/2)
            y = conv_relu(slab, abuf[0:c2, 0:P1p], c2, Wp1, P1p, w3, b3)
            abuf[0:c3, 0:P1p] = pltpu.roll(y, Wp1 + 1, axis=1) * m1[...]
            # features[7..9]: conv + ReLU + maxpool                (-> H/4 x W/4)
            y = conv_relu(slab, abuf[0:c3, 0:P1p], c3, Wp1, P1p, w4, b4)
            abuf[0:c4, 0:P2p] = pool2x2(y, Wp1, s2)
            # features[10..11]: conv + ReLU                        (H/4 x W/4)
            y = conv_relu(slab, abuf[0:c4, 0:P2p], c4, Wp2, P2p, w5, b5)
            # lane-dense store of the shifted-flat frame; wrapper drops the
            # 2 garbage columns per row.
            o_ref[s] = y

    return kernel


# -----------------------------------------------------------------------------
# FeatureExtractor: features[:12] of a VGG-style backbone
# -----------------------------------------------------------------------------
class FeatureExtractor:
    """conv-relu, conv-relu, pool, conv-relu, conv-relu, pool, conv-relu
    (eval mode; no dropout / BN in this truncation)."""

    def __init__(self, key, in_ch=3, widths=(8, 8, 16, 16, 32)):
        self.in_ch = in_ch
        self.widths = tuple(widths)
        self.params = []
        cin = in_ch
        for cout in widths:
            kw, kb, key = jax.random.split(key, 3)
            w = jax.random.normal(kw, (cout, cin, 3, 3), jnp.float32) * 0.1
            b = jax.random.normal(kb, (cout,), jnp.float32) * 0.01
            self.params.append((w, b))
            cin = cout

    def __call__(self, x_nchw):
        N, C, H, W = x_nchw.shape
        assert C == self.in_ch and H % 4 == 0 and W % 4 == 0
        c1, c2, c3, c4, c5 = self.widths
        cin_pad = _round_up(self.in_ch, 8)
        Wp0, Wp1, Wp2 = W + 2, W // 2 + 2, W // 4 + 2
        P0 = (H + 2) * Wp0
        P1 = (H // 2 + 2) * Wp1
        P2 = (H // 4 + 2) * Wp2
        P0p, P1p, P2p = (_round_up(p, 128) for p in (P0, P1, P2))

        # Samples per grid step; keep >= 2 grid steps so both v7x TCs get work.
        b_tile = max(1, min(4, N // 2))
        while N % b_tile:
            b_tile -= 1
        grid = (N // b_tile,)

        # Tiny host-side constants.
        m0 = jnp.asarray(_halo_mask(H, W, P0p))
        m1 = jnp.asarray(_halo_mask(H // 2, W // 2, P1p))
        s1 = jnp.asarray(_pool_reloc_mat(H, W, P0p, P1p))
        s2 = jnp.asarray(_pool_reloc_mat(H // 2, W // 2, P1p, P2p))

        # Weights as bf16 im2col matrices (Cout, 9*Cin_pad); biases (Cout, 1).
        cins = (cin_pad, c1, c2, c3, c4)
        packed = []
        for (w, b), ci in zip(self.params, cins):
            packed.append(_pack_weight(w, ci))
            packed.append(b.reshape(-1, 1).astype(jnp.float32))

        # Input glue: NCHW -> channel-major padded-flat (N, cin_pad, P0p),
        # lane-dense (P0p is a multiple of 128).
        xp = jnp.pad(x_nchw, ((0, 0), (0, cin_pad - C), (1, 1), (1, 1)))
        xp = xp.reshape(N, cin_pad, P0).astype(jnp.float32)
        xp = jnp.pad(xp, ((0, 0), (0, 0), (0, P0p - P0)))

        consts = [m0, m1, s1, s2]
        operands = [xp] + packed + consts
        in_specs = ([pl.BlockSpec((b_tile, cin_pad, P0p), lambda n: (n, 0, 0))]
                    + [_full_spec(a) for a in packed + consts])

        c_act = max(c1, c2, c3, c4)       # widest activation kept in VMEM
        k_max = 9 * max(cins)             # widest im2col slab (rows)
        kernel = _make_fused_kernel(H, W, cin_pad, self.widths, b_tile,
                                    (P0p, P1p, P2p))
        out = pl.pallas_call(
            kernel,
            out_shape=jax.ShapeDtypeStruct((N, c5, P2p), jnp.float32),
            grid=grid,
            in_specs=in_specs,
            out_specs=pl.BlockSpec((b_tile, c5, P2p), lambda n: (n, 0, 0)),
            scratch_shapes=[pltpu.VMEM((c_act, P0p), jnp.float32),   # padded act
                            pltpu.VMEM((k_max, P0p), jnp.float32)],  # im2col slab
            compiler_params=pltpu.CompilerParams(
                dimension_semantics=("parallel",),
                vmem_limit_bytes=32 * 1024 * 1024),
        )(*operands)

        # Drop the 2 garbage columns per row of the shifted-flat frame ->
        # NCHW (final tensor is ~KiB, this indexing is free glue).
        valid = np.asarray([i * Wp2 + j for i in range(H // 4)
                            for j in range(W // 4)], np.int32)
        return out[:, :, valid].reshape(N, c5, H // 4, W // 4)


# -----------------------------------------------------------------------------
# Pure-JAX reference (for correctness check)
# -----------------------------------------------------------------------------
def _ref_forward(x_nchw, params):
    def conv(x, w, b):
        y = jax.lax.conv_general_dilated(
            x, w, window_strides=(1, 1), padding=((1, 1), (1, 1)),
            dimension_numbers=("NCHW", "OIHW", "NCHW"))
        return jax.nn.relu(y + b[None, :, None, None])

    def pool(x):
        return jax.lax.reduce_window(x, -jnp.inf, jax.lax.max,
                                     (1, 1, 2, 2), (1, 1, 2, 2), "VALID")

    (w0, b0), (w1, b1), (w2, b2), (w3, b3), (w4, b4) = params
    x = conv(x_nchw, w0, b0)
    x = conv(x, w1, b1)
    x = pool(x)
    x = conv(x, w2, b2)
    x = conv(x, w3, b3)
    x = pool(x)
    x = conv(x, w4, b4)
    return x


if __name__ == "__main__":
    key = jax.random.PRNGKey(0)
    k_in, k_params = jax.random.split(key)

    x = jax.random.normal(k_in, (2, 3, 16, 16), jnp.float32)  # NCHW input
    extractor = FeatureExtractor(k_params)

    out = jax.block_until_ready(extractor(x))           # (2, 32, 4, 4)
    ref = jax.block_until_ready(_ref_forward(x, extractor.params))

    assert out.shape == (2, 32, 4, 4), out.shape
    # bf16 MXU operands -> relaxed (mixed abs/rel) tolerance vs the f32 ref.
    err = float(jnp.max(jnp.abs(out - ref) / (jnp.abs(ref) + 1.0)))
    assert err < 4e-2, f"mismatch vs reference: {err}"

    print("KERNEL_OK")
</pallas_src>

<mosaic_0001>
module attributes {stable_mosaic.version = 11 : i64} {
  func.func @kernel(%arg0: i32, %arg1: memref<1x8x384xf32, #tpu.memory_space<vmem>>, %arg2: memref<8x72xbf16, #tpu.memory_space<vmem>>, %arg3: memref<8x1xf32, #tpu.memory_space<vmem>>, %arg4: memref<8x72xbf16, #tpu.memory_space<vmem>>, %arg5: memref<8x1xf32, #tpu.memory_space<vmem>>, %arg6: memref<16x72xbf16, #tpu.memory_space<vmem>>, %arg7: memref<16x1xf32, #tpu.memory_space<vmem>>, %arg8: memref<16x144xbf16, #tpu.memory_space<vmem>>, %arg9: memref<16x1xf32, #tpu.memory_space<vmem>>, %arg10: memref<32x144xbf16, #tpu.memory_space<vmem>>, %arg11: memref<32x1xf32, #tpu.memory_space<vmem>>, %arg12: memref<1x384xf32, #tpu.memory_space<vmem>>, %arg13: memref<1x128xf32, #tpu.memory_space<vmem>>, %arg14: memref<384x128xf32, #tpu.memory_space<vmem>>, %arg15: memref<128x128xf32, #tpu.memory_space<vmem>>, %arg16: memref<1x32x128xf32, #tpu.memory_space<vmem>>, %arg17: memref<16x384xf32, #tpu.memory_space<vmem>>, %arg18: memref<144x384xf32, #tpu.memory_space<vmem>>) attributes {dimension_semantics = [#tpu.dimension_semantics<parallel>], iteration_bounds = array<i64: 2>, scalar_prefetch = 0 : i64, scratch_operands = 2 : i64, tpu.core_type = #tpu.core_type<tc>, window_params = [{transform_indices = @transform_0, window_bounds = array<i64: 1, 8, 384>}, {pipeline_mode = #tpu.pipeline_mode<synchronous>, transform_indices = @transform_1, window_bounds = array<i64: 8, 72>}, {pipeline_mode = #tpu.pipeline_mode<synchronous>, transform_indices = @transform_2, window_bounds = array<i64: 8, 1>}, {pipeline_mode = #tpu.pipeline_mode<synchronous>, transform_indices = @transform_3, window_bounds = array<i64: 8, 72>}, {pipeline_mode = #tpu.pipeline_mode<synchronous>, transform_indices = @transform_4, window_bounds = array<i64: 8, 1>}, {pipeline_mode = #tpu.pipeline_mode<synchronous>, transform_indices = @transform_5, window_bounds = array<i64: 16, 72>}, {pipeline_mode = #tpu.pipeline_mode<synchronous>, transform_indices = @transform_6, window_bounds = array<i64: 16, 1>}, {pipeline_mode = #tpu.pipeline_mode<synchronous>, transform_indices = @transform_7, window_bounds = array<i64: 16, 144>}, {pipeline_mode = #tpu.pipeline_mode<synchronous>, transform_indices = @transform_8, window_bounds = array<i64: 16, 1>}, {pipeline_mode = #tpu.pipeline_mode<synchronous>, transform_indices = @transform_9, window_bounds = array<i64: 32, 144>}, {pipeline_mode = #tpu.pipeline_mode<synchronous>, transform_indices = @transform_10, window_bounds = array<i64: 32, 1>}, {pipeline_mode = #tpu.pipeline_mode<synchronous>, transform_indices = @transform_11, window_bounds = array<i64: 1, 384>}, {pipeline_mode = #tpu.pipeline_mode<synchronous>, transform_indices = @transform_12, window_bounds = array<i64: 1, 128>}, {pipeline_mode = #tpu.pipeline_mode<synchronous>, transform_indices = @transform_13, window_bounds = array<i64: 384, 128>}, {pipeline_mode = #tpu.pipeline_mode<synchronous>, transform_indices = @transform_14, window_bounds = array<i64: 128, 128>}, {transform_indices = @transform_15, window_bounds = array<i64: 1, 32, 128>}]} {
    %c0 = arith.constant 0 : index
    %c0_0 = arith.constant 0 : index
    %c0_1 = arith.constant 0 : index
    %0 = vector.load %arg1[%c0, %c0_0, %c0_1] : memref<1x8x384xf32, #tpu.memory_space<vmem>>, vector<1x8x384xf32>
    %1 = vector.shape_cast %0 : vector<1x8x384xf32> to vector<8x384xf32>
    %c0_2 = arith.constant 0 : index
    %c0_3 = arith.constant 0 : index
    %2 = vector.load %arg18[%c0_2, %c0_3] : memref<144x384xf32, #tpu.memory_space<vmem>>, vector<8x384xf32>
    tpu.vector_store %arg18[%c0_2, %c0_3], %1 {strides = array<i32>} : memref<144x384xf32, #tpu.memory_space<vmem>>, vector<8x384xf32>,
    %c383_i32 = arith.constant 383 : i32
    %3 = tpu.dynamic_rotate %1 by %c383_i32 dim 1 : vector<8x384xf32>, i32 -> vector<8x384xf32>
    %c8 = arith.constant 8 : index
    %c0_4 = arith.constant 0 : index
    %4 = vector.load %arg18[%c8, %c0_4] : memref<144x384xf32, #tpu.memory_space<vmem>>, vector<8x384xf32>
    tpu.vector_store %arg18[%c8, %c0_4], %3 {strides = array<i32>} : memref<144x384xf32, #tpu.memory_space<vmem>>, vector<8x384xf32>,
    %c382_i32 = arith.constant 382 : i32
    %5 = tpu.dynamic_rotate %1 by %c382_i32 dim 1 : vector<8x384xf32>, i32 -> vector<8x384xf32>
    %c16 = arith.constant 16 : index
    %c0_5 = arith.constant 0 : index
    %6 = vector.load %arg18[%c16, %c0_5] : memref<144x384xf32, #tpu.memory_space<vmem>>, vector<8x384xf32>
    tpu.vector_store %arg18[%c16, %c0_5], %5 {strides = array<i32>} : memref<144x384xf32, #tpu.memory_space<vmem>>, vector<8x384xf32>,
    %c366_i32 = arith.constant 366 : i32
    %7 = tpu.dynamic_rotate %1 by %c366_i32 dim 1 : vector<8x384xf32>, i32 -> vector<8x384xf32>
    %c24 = arith.constant 24 : index
    %c0_6 = arith.constant 0 : index
    %8 = vector.load %arg18[%c24, %c0_6] : memref<144x384xf32, #tpu.memory_space<vmem>>, vector<8x384xf32>
    tpu.vector_store %arg18[%c24, %c0_6], %7 {strides = array<i32>} : memref<144x384xf32, #tpu.memory_space<vmem>>, vector<8x384xf32>,
    %c365_i32 = arith.constant 365 : i32
    %9 = tpu.dynamic_rotate %1 by %c365_i32 dim 1 : vector<8x384xf32>, i32 -> vector<8x384xf32>
    %c32 = arith.constant 32 : index
    %c0_7 = arith.constant 0 : index
    %10 = vector.load %arg18[%c32, %c0_7] : memref<144x384xf32, #tpu.memory_space<vmem>>, vector<8x384xf32>
    tpu.vector_store %arg18[%c32, %c0_7], %9 {strides = array<i32>} : memref<144x384xf32, #tpu.memory_space<vmem>>, vector<8x384xf32>,
    %c364_i32 = arith.constant 364 : i32
    %11 = tpu.dynamic_rotate %1 by %c364_i32 dim 1 : vector<8x384xf32>, i32 -> vector<8x384xf32>
    %c40 = arith.constant 40 : index
    %c0_8 = arith.constant 0 : index
    %12 = vector.load %arg18[%c40, %c0_8] : memref<144x384xf32, #tpu.memory_space<vmem>>, vector<8x384xf32>
    tpu.vector_store %arg18[%c40, %c0_8], %11 {strides = array<i32>} : memref<144x384xf32, #tpu.memory_space<vmem>>, vector<8x384xf32>,
    %c348_i32 = arith.constant 348 : i32
    %13 = tpu.dynamic_rotate %1 by %c348_i32 dim 1 : vector<8x384xf32>, i32 -> vector<8x384xf32>
    %c48 = arith.constant 48 : index
    %c0_9 = arith.constant 0 : index
    %14 = vector.load %arg18[%c48, %c0_9] : memref<144x384xf32, #tpu.memory_space<vmem>>, vector<8x384xf32>
    tpu.vector_store %arg18[%c48, %c0_9], %13 {strides = array<i32>} : memref<144x384xf32, #tpu.memory_space<vmem>>, vector<8x384xf32>,
    %c347_i32 = arith.constant 347 : i32
    %15 = tpu.dynamic_rotate %1 by %c347_i32 dim 1 : vector<8x384xf32>, i32 -> vector<8x384xf32>
    %c56 = arith.constant 56 : index
    %c0_10 = arith.constant 0 : index
    %16 = vector.load %arg18[%c56, %c0_10] : memref<144x384xf32, #tpu.memory_space<vmem>>, vector<8x384xf32>
    tpu.vector_store %arg18[%c56, %c0_10], %15 {strides = array<i32>} : memref<144x384xf32, #tpu.memory_space<vmem>>, vector<8x384xf32>,
    %c346_i32 = arith.constant 346 : i32
    %17 = tpu.dynamic_rotate %1 by %c346_i32 dim 1 : vector<8x384xf32>, i32 -> vector<8x384xf32>
    %c64 = arith.constant 64 : index
    %c0_11 = arith.constant 0 : index
    %18 = vector.load %arg18[%c64, %c0_11] : memref<144x384xf32, #tpu.memory_space<vmem>>, vector<8x384xf32>
    tpu.vector_store %arg18[%c64, %c0_11], %17 {strides = array<i32>} : memref<144x384xf32, #tpu.memory_space<vmem>>, vector<8x384xf32>,
    %c0_12 = arith.constant 0 : index
    %c0_13 = arith.constant 0 : index
    %19 = vector.load %arg18[%c0_12, %c0_13] : memref<144x384xf32, #tpu.memory_space<vmem>>, vector<72x384xf32>
    %20 = arith.truncf %19 : vector<72x384xf32> to vector<72x384xbf16>
    %c0_14 = arith.constant 0 : index
    %c0_15 = arith.constant 0 : index
    %21 = vector.load %arg2[%c0_14, %c0_15] : memref<8x72xbf16, #tpu.memory_space<vmem>>, vector<8x72xbf16>
    %cst = arith.constant dense<0.000000e+00> : vector<8x384xf32>
    %22 = tpu.matmul %21, %20, %cst {dimension_numbers = #tpu.dot_dimension_numbers<[1], [0], [0], [1], [0, 0, 1, 1], [], []>} : vector<8x72xbf16>, vector<72x384xbf16>, vector<8x384xf32> -> vector<8x384xf32>
    %c0_16 = arith.constant 0 : index
    %c0_17 = arith.constant 0 : index
    %23 = vector.load %arg3[%c0_16, %c0_17] : memref<8x1xf32, #tpu.memory_space<vmem>>, vector<8x1xf32>
    %24 = vector.broadcast %23 : vector<8x1xf32> to vector<8x384xf32>
    %25 = arith.addf %22, %24 : vector<8x384xf32>
    %cst_18 = arith.constant 0.000000e+00 : f32
    %26 = vector.broadcast %cst_18 : f32 to vector<8x384xf32>
    %27 = arith.maximumf %25, %26 : vector<8x384xf32>
    %c19_i32 = arith.constant 19 : i32
    %28 = tpu.dynamic_rotate %27 by %c19_i32 dim 1 : vector<8x384xf32>, i32 -> vector<8x384xf32>
    %c0_19 = arith.constant 0 : index
    %c0_20 = arith.constant 0 : index
    %29 = vector.load %arg12[%c0_19, %c0_20] : memref<1x384xf32, #tpu.memory_space<vmem>>, vector<1x384xf32>
    %30 = vector.broadcast %29 : vector<1x384xf32> to vector<8x384xf32>
    %31 = arith.mulf %28, %30 : vector<8x384xf32>
    %c0_21 = arith.constant 0 : index
    %c0_22 = arith.constant 0 : index
    %32 = vector.load %arg17[%c0_21, %c0_22] : memref<16x384xf32, #tpu.memory_space<vmem>>, vector<8x384xf32>
    tpu.vector_store %arg17[%c0_21, %c0_22], %31 {strides = array<i32>} : memref<16x384xf32, #tpu.memory_space<vmem>>, vector<8x384xf32>,
    %c0_23 = arith.constant 0 : index
    %c0_24 = arith.constant 0 : index
    %33 = vector.load %arg17[%c0_23, %c0_24] : memref<16x384xf32, #tpu.memory_space<vmem>>, vector<8x384xf32>
    %c0_25 = arith.constant 0 : index
    %c0_26 = arith.constant 0 : index
    %34 = vector.load %arg18[%c0_25, %c0_26] : memref<144x384xf32, #tpu.memory_space<vmem>>, vector<8x384xf32>
    tpu.vector_store %arg18[%c0_25, %c0_26], %33 {strides = array<i32>} : memref<144x384xf32, #tpu.memory_space<vmem>>, vector<8x384xf32>,
    %c383_i32_27 = arith.constant 383 : i32
    %35 = tpu.dynamic_rotate %33 by %c383_i32_27 dim 1 : vector<8x384xf32>, i32 -> vector<8x384xf32>
    %c8_28 = arith.constant 8 : index
    %c0_29 = arith.constant 0 : index
    %36 = vector.load %arg18[%c8_28, %c0_29] : memref<144x384xf32, #tpu.memory_space<vmem>>, vector<8x384xf32>
    tpu.vector_store %arg18[%c8_28, %c0_29], %35 {strides = array<i32>} : memref<144x384xf32, #tpu.memory_space<vmem>>, vector<8x384xf32>,
    %c382_i32_30 = arith.constant 382 : i32
    %37 = tpu.dynamic_rotate %33 by %c382_i32_30 dim 1 : vector<8x384xf32>, i32 -> vector<8x384xf32>
    %c16_31 = arith.constant 16 : index
    %c0_32 = arith.constant 0 : index
    %38 = vector.load %arg18[%c16_31, %c0_32] : memref<144x384xf32, #tpu.memory_space<vmem>>, vector<8x384xf32>
    tpu.vector_store %arg18[%c16_31, %c0_32], %37 {strides = array<i32>} : memref<144x384xf32, #tpu.memory_space<vmem>>, vector<8x384xf32>,
    %c366_i32_33 = arith.constant 366 : i32
    %39 = tpu.dynamic_rotate %33 by %c366_i32_33 dim 1 : vector<8x384xf32>, i32 -> vector<8x384xf32>
    %c24_34 = arith.constant 24 : index
    %c0_35 = arith.constant 0 : index
    %40 = vector.load %arg18[%c24_34, %c0_35] : memref<144x384xf32, #tpu.memory_space<vmem>>, vector<8x384xf32>
    tpu.vector_store %arg18[%c24_34, %c0_35], %39 {strides = array<i32>} : memref<144x384xf32, #tpu.memory_space<vmem>>, vector<8x384xf32>,
    %c365_i32_36 = arith.constant 365 : i32
    %41 = tpu.dynamic_rotate %33 by %c365_i32_36 dim 1 : vector<8x384xf32>, i32 -> vector<8x384xf32>
    %c32_37 = arith.constant 32 : index
    %c0_38 = arith.constant 0 : index
    %42 = vector.load %arg18[%c32_37, %c0_38] : memref<144x384xf32, #tpu.memory_space<vmem>>, vector<8x384xf32>
    tpu.vector_store %arg18[%c32_37, %c0_38], %41 {strides = array<i32>} : memref<144x384xf32, #tpu.memory_space<vmem>>, vector<8x384xf32>,
    %c364_i32_39 = arith.constant 364 : i32
    %43 = tpu.dynamic_rotate %33 by %c364_i32_39 dim 1 : vector<8x384xf32>, i32 -> vector<8x384xf32>
    %c40_40 = arith.constant 40 : index
    %c0_41 = arith.constant 0 : index
    %44 = vector.load %arg18[%c40_40, %c0_41] : memref<144x384xf32, #tpu.memory_space<vmem>>, vector<8x384xf32>
    tpu.vector_store %arg18[%c40_40, %c0_41], %43 {strides = array<i32>} : memref<144x384xf32, #tpu.memory_space<vmem>>, vector<8x384xf32>,
    %c348_i32_42 = arith.constant 348 : i32
    %45 = tpu.dynamic_rotate %33 by %c348_i32_42 dim 1 : vector<8x384xf32>, i32 -> vector<8x384xf32>
    %c48_43 = arith.constant 48 : index
    %c0_44 = arith.constant 0 : index
    %46 = vector.load %arg18[%c48_43, %c0_44] : memref<144x384xf32, #tpu.memory_space<vmem>>, vector<8x384xf32>
    tpu.vector_store %arg18[%c48_43, %c0_44], %45 {strides = array<i32>} : memref<144x384xf32, #tpu.memory_space<vmem>>, vector<8x384xf32>,
    %c347_i32_45 = arith.constant 347 : i32
    %47 = tpu.dynamic_rotate %33 by %c347_i32_45 dim 1 : vector<8x384xf32>, i32 -> vector<8x384xf32>
    %c56_46 = arith.constant 56 : index
    %c0_47 = arith.constant 0 : index
    %48 = vector.load %arg18[%c56_46, %c0_47] : memref<144x384xf32, #tpu.memory_space<vmem>>, vector<8x384xf32>
    tpu.vector_store %arg18[%c56_46, %c0_47], %47 {strides = array<i32>} : memref<144x384xf32, #tpu.memory_space<vmem>>, vector<8x384xf32>,
    %c346_i32_48 = arith.constant 346 : i32
    %49 = tpu.dynamic_rotate %33 by %c346_i32_48 dim 1 : vector<8x384xf32>, i32 -> vector<8x384xf32>
    %c64_49 = arith.constant 64 : index
    %c0_50 = arith.constant 0 : index
    %50 = vector.load %arg18[%c64_49, %c0_50] : memref<144x384xf32, #tpu.memory_space<vmem>>, vector<8x384xf32>
    tpu.vector_store %arg18[%c64_49, %c0_50], %49 {strides = array<i32>} : memref<144x384xf32, #tpu.memory_space<vmem>>, vector<8x384xf32>,
    %c0_51 = arith.constant 0 : index
    %c0_52 = arith.constant 0 : index
    %51 = vector.load %arg18[%c0_51, %c0_52] : memref<144x384xf32, #tpu.memory_space<vmem>>, vector<72x384xf32>
    %52 = arith.truncf %51 : vector<72x384xf32> to vector<72x384xbf16>
    %c0_53 = arith.constant 0 : index
    %c0_54 = arith.constant 0 : index
    %53 = vector.load %arg4[%c0_53, %c0_54] : memref<8x72xbf16, #tpu.memory_space<vmem>>, vector<8x72xbf16>
    %cst_55 = arith.constant dense<0.000000e+00> : vector<8x384xf32>
    %54 = tpu.matmul %53, %52, %cst_55 {dimension_numbers = #tpu.dot_dimension_numbers<[1], [0], [0], [1], [0, 0, 1, 1], [], []>} : vector<8x72xbf16>, vector<72x384xbf16>, vector<8x384xf32> -> vector<8x384xf32>
    %c0_56 = arith.constant 0 : index
    %c0_57 = arith.constant 0 : index
    %55 = vector.load %arg5[%c0_56, %c0_57] : memref<8x1xf32, #tpu.memory_space<vmem>>, vector<8x1xf32>
    %56 = vector.broadcast %55 : vector<8x1xf32> to vector<8x384xf32>
    %57 = arith.addf %54, %56 : vector<8x384xf32>
    %cst_58 = arith.constant 0.000000e+00 : f32
    %58 = vector.broadcast %cst_58 : f32 to vector<8x384xf32>
    %59 = arith.maximumf %57, %58 : vector<8x384xf32>
    %c383_i32_59 = arith.constant 383 : i32
    %60 = tpu.dynamic_rotate %59 by %c383_i32_59 dim 1 : vector<8x384xf32>, i32 -> vector<8x384xf32>
    %61 = arith.maximumf %59, %60 : vector<8x384xf32>
    %c366_i32_60 = arith.constant 366 : i32
    %62 = tpu.dynamic_rotate %61 by %c366_i32_60 dim 1 : vector<8x384xf32>, i32 -> vector<8x384xf32>
    %63 = arith.maximumf %61, %62 : vector<8x384xf32>
    %c0_61 = arith.constant 0 : index
    %c0_62 = arith.constant 0 : index
    %64 = vector.load %arg14[%c0_61, %c0_62] : memref<384x128xf32, #tpu.memory_space<vmem>>, vector<384x128xf32>
    %cst_63 = arith.constant dense<0.000000e+00> : vector<8x128xf32>
    %65 = tpu.matmul %63, %64, %cst_63 {dimension_numbers = #tpu.dot_dimension_numbers<[1], [0], [0], [1], [0, 0, 1, 1], [], []>} : vector<8x384xf32>, vector<384x128xf32>, vector<8x128xf32> -> vector<8x128xf32>
    %c0_64 = arith.constant 0 : index
    %c0_65 = arith.constant 0 : index
    %66 = vector.load %arg17[%c0_64, %c0_65] : memref<16x384xf32, #tpu.memory_space<vmem>>, vector<8x128xf32>
    tpu.vector_store %arg17[%c0_64, %c0_65], %65 {strides = array<i32>} : memref<16x384xf32, #tpu.memory_space<vmem>>, vector<8x128xf32>,
    %c0_66 = arith.constant 0 : index
    %c0_67 = arith.constant 0 : index
    %67 = vector.load %arg17[%c0_66, %c0_67] : memref<16x384xf32, #tpu.memory_space<vmem>>, vector<8x128xf32>
    %c0_68 = arith.constant 0 : index
    %c0_69 = arith.constant 0 : index
    %68 = vector.load %arg18[%c0_68, %c0_69] : memref<144x384xf32, #tpu.memory_space<vmem>>, vector<8x128xf32>
    tpu.vector_store %arg18[%c0_68, %c0_69], %67 {strides = array<i32>} : memref<144x384xf32, #tpu.memory_space<vmem>>, vector<8x128xf32>,
    %c127_i32 = arith.constant 127 : i32
    %69 = tpu.dynamic_rotate %67 by %c127_i32 dim 1 : vector<8x128xf32>, i32 -> vector<8x128xf32>
    %c8_70 = arith.constant 8 : index
    %c0_71 = arith.constant 0 : index
    %70 = vector.load %arg18[%c8_70, %c0_71] : memref<144x384xf32, #tpu.memory_space<vmem>>, vector<8x128xf32>
    tpu.vector_store %arg18[%c8_70, %c0_71], %69 {strides = array<i32>} : memref<144x384xf32, #tpu.memory_space<vmem>>, vector<8x128xf32>,
    %c126_i32 = arith.constant 126 : i32
    %71 = tpu.dynamic_rotate %67 by %c126_i32 dim 1 : vector<8x128xf32>, i32 -> vector<8x128xf32>
    %c16_72 = arith.constant 16 : index
    %c0_73 = arith.constant 0 : index
    %72 = vector.load %arg18[%c16_72, %c0_73] : memref<144x384xf32, #tpu.memory_space<vmem>>, vector<8x128xf32>
    tpu.vector_store %arg18[%c16_72, %c0_73], %71 {strides = array<i32>} : memref<144x384xf32, #tpu.memory_space<vmem>>, vector<8x128xf32>,
    %c118_i32 = arith.constant 118 : i32
    %73 = tpu.dynamic_rotate %67 by %c118_i32 dim 1 : vector<8x128xf32>, i32 -> vector<8x128xf32>
    %c24_74 = arith.constant 24 : index
    %c0_75 = arith.constant 0 : index
    %74 = vector.load %arg18[%c24_74, %c0_75] : memref<144x384xf32, #tpu.memory_space<vmem>>, vector<8x128xf32>
    tpu.vector_store %arg18[%c24_74, %c0_75], %73 {strides = array<i32>} : memref<144x384xf32, #tpu.memory_space<vmem>>, vector<8x128xf32>,
    %c117_i32 = arith.constant 117 : i32
    %75 = tpu.dynamic_rotate %67 by %c117_i32 dim 1 : vector<8x128xf32>, i32 -> vector<8x128xf32>
    %c32_76 = arith.constant 32 : index
    %c0_77 = arith.constant 0 : index
    %76 = vector.load %arg18[%c32_76, %c0_77] : memref<144x384xf32, #tpu.memory_space<vmem>>, vector<8x128xf32>
    tpu.vector_store %arg18[%c32_76, %c0_77], %75 {strides = array<i32>} : memref<144x384xf32, #tpu.memory_space<vmem>>, vector<8x128xf32>,
    %c116_i32 = arith.constant 116 : i32
    %77 = tpu.dynamic_rotate %67 by %c116_i32 dim 1 : vector<8x128xf32>, i32 -> vector<8x128xf32>
    %c40_78 = arith.constant 40 : index
    %c0_79 = arith.constant 0 : index
    %78 = vector.load %arg18[%c40_78, %c0_79] : memref<144x384xf32, #tpu.memory_space<vmem>>, vector<8x128xf32>
    tpu.vector_store %arg18[%c40_78, %c0_79], %77 {strides = array<i32>} : memref<144x384xf32, #tpu.memory_space<vmem>>, vector<8x128xf32>,
    %c108_i32 = arith.constant 108 : i32
    %79 = tpu.dynamic_rotate %67 by %c108_i32 dim 1 : vector<8x128xf32>, i32 -> vector<8x128xf32>
    %c48_80 = arith.constant 48 : index
    %c0_81 = arith.constant 0 : index
    %80 = vector.load %arg18[%c48_80, %c0_81] : memref<144x384xf32, #tpu.memory_space<vmem>>, vector<8x128xf32>
    tpu.vector_store %arg18[%c48_80, %c0_81], %79 {strides = array<i32>} : memref<144x384xf32, #tpu.memory_space<vmem>>, vector<8x128xf32>,
    %c107_i32 = arith.constant 107 : i32
    %81 = tpu.dynamic_rotate %67 by %c107_i32 dim 1 : vector<8x128xf32>, i32 -> vector<8x128xf32>
    %c56_82 = arith.constant 56 : index
    %c0_83 = arith.constant 0 : index
    %82 = vector.load %arg18[%c56_82, %c0_83] : memref<144x384xf32, #tpu.memory_space<vmem>>, vector<8x128xf32>
    tpu.vector_store %arg18[%c56_82, %c0_83], %81 {strides = array<i32>} : memref<144x384xf32, #tpu.memory_space<vmem>>, vector<8x128xf32>,
    %c106_i32 = arith.constant 106 : i32
    %83 = tpu.dynamic_rotate %67 by %c106_i32 dim 1 : vector<8x128xf32>, i32 -> vector<8x128xf32>
    %c64_84 = arith.constant 64 : index
    %c0_85 = arith.constant 0 : index
    %84 = vector.load %arg18[%c64_84, %c0_85] : memref<144x384xf32, #tpu.memory_space<vmem>>, vector<8x128xf32>
    tpu.vector_store %arg18[%c64_84, %c0_85], %83 {strides = array<i32>} : memref<144x384xf32, #tpu.memory_space<vmem>>, vector<8x128xf32>,
    %c0_86 = arith.constant 0 : index
    %c0_87 = arith.constant 0 : index
    %85 = vector.load %arg18[%c0_86, %c0_87] : memref<144x384xf32, #tpu.memory_space<vmem>>, vector<72x128xf32>
    %86 = arith.truncf %85 : vector<72x128xf32> to vector<72x128xbf16>
    %c0_88 = arith.constant 0 : index
    %c0_89 = arith.constant 0 : index
    %87 = vector.load %arg6[%c0_88, %c0_89] : memref<16x72xbf16, #tpu.memory_space<vmem>>, vector<16x72xbf16>
    %cst_90 = arith.constant dense<0.000000e+00> : vector<16x128xf32>
    %88 = tpu.matmul %87, %86, %cst_90 {dimension_numbers = #tpu.dot_dimension_numbers<[1], [0], [0], [1], [0, 0, 1, 1], [], []>} : vector<16x72xbf16>, vector<72x128xbf16>, vector<16x128xf32> -> vector<16x128xf32>
    %c0_91 = arith.constant 0 : index
    %c0_92 = arith.constant 0 : index
    %89 = vector.load %arg7[%c0_91, %c0_92] : memref<16x1xf32, #tpu.memory_space<vmem>>, vector<16x1xf32>
    %90 = vector.broadcast %89 : vector<16x1xf32> to vector<16x128xf32>
    %91 = arith.addf %88, %90 : vector<16x128xf32>
    %cst_93 = arith.constant 0.000000e+00 : f32
    %92 = vector.broadcast %cst_93 : f32 to vector<16x128xf32>
    %93 = arith.maximumf %91, %92 : vector<16x128xf32>
    %c11_i32 = arith.constant 11 : i32
    %94 = tpu.dynamic_rotate %93 by %c11_i32 dim 1 : vector<16x128xf32>, i32 -> vector<16x128xf32>
    %c0_94 = arith.constant 0 : index
    %c0_95 = arith.constant 0 : index
    %95 = vector.load %arg13[%c0_94, %c0_95] : memref<1x128xf32, #tpu.memory_space<vmem>>, vector<1x128xf32>
    %96 = vector.broadcast %95 : vector<1x128xf32> to vector<16x128xf32>
    %97 = arith.mulf %94, %96 : vector<16x128xf32>
    %c0_96 = arith.constant 0 : index
    %c0_97 = arith.constant 0 : index
    %98 = vector.load %arg17[%c0_96, %c0_97] : memref<16x384xf32, #tpu.memory_space<vmem>>, vector<16x128xf32>
    tpu.vector_store %arg17[%c0_96, %c0_97], %97 {strides = array<i32>} : memref<16x384xf32, #tpu.memory_space<vmem>>, vector<16x128xf32>,
    %c0_98 = arith.constant 0 : index
    %c0_99 = arith.constant 0 : index
    %99 = vector.load %arg17[%c0_98, %c0_99] : memref<16x384xf32, #tpu.memory_space<vmem>>, vector<16x128xf32>
    %c0_100 = arith.constant 0 : index
    %c0_101 = arith.constant 0 : index
    %100 = vector.load %arg18[%c0_100, %c0_101] : memref<144x384xf32, #tpu.memory_space<vmem>>, vector<16x128xf32>
    tpu.vector_store %arg18[%c0_100, %c0_101], %99 {strides = array<i32>} : memref<144x384xf32, #tpu.memory_space<vmem>>, vector<16x128xf32>,
    %c127_i32_102 = arith.constant 127 : i32
    %101 = tpu.dynamic_rotate %99 by %c127_i32_102 dim 1 : vector<16x128xf32>, i32 -> vector<16x128xf32>
    %c16_103 = arith.constant 16 : index
    %c0_104 = arith.constant 0 : index
    %102 = vector.load %arg18[%c16_103, %c0_104] : memref<144x384xf32, #tpu.memory_space<vmem>>, vector<16x128xf32>
    tpu.vector_store %arg18[%c16_103, %c0_104], %101 {strides = array<i32>} : memref<144x384xf32, #tpu.memory_space<vmem>>, vector<16x128xf32>,
    %c126_i32_105 = arith.constant 126 : i32
    %103 = tpu.dynamic_rotate %99 by %c126_i32_105 dim 1 : vector<16x128xf32>, i32 -> vector<16x128xf32>
    %c32_106 = arith.constant 32 : index
    %c0_107 = arith.constant 0 : index
    %104 = vector.load %arg18[%c32_106, %c0_107] : memref<144x384xf32, #tpu.memory_space<vmem>>, vector<16x128xf32>
    tpu.vector_store %arg18[%c32_106, %c0_107], %103 {strides = array<i32>} : memref<144x384xf32, #tpu.memory_space<vmem>>, vector<16x128xf32>,
    %c118_i32_108 = arith.constant 118 : i32
    %105 = tpu.dynamic_rotate %99 by %c118_i32_108 dim 1 : vector<16x128xf32>, i32 -> vector<16x128xf32>
    %c48_109 = arith.constant 48 : index
    %c0_110 = arith.constant 0 : index
    %106 = vector.load %arg18[%c48_109, %c0_110] : memref<144x384xf32, #tpu.memory_space<vmem>>, vector<16x128xf32>
    tpu.vector_store %arg18[%c48_109, %c0_110], %105 {strides = array<i32>} : memref<144x384xf32, #tpu.memory_space<vmem>>, vector<16x128xf32>,
    %c117_i32_111 = arith.constant 117 : i32
    %107 = tpu.dynamic_rotate %99 by %c117_i32_111 dim 1 : vector<16x128xf32>, i32 -> vector<16x128xf32>
    %c64_112 = arith.constant 64 : index
    %c0_113 = arith.constant 0 : index
    %108 = vector.load %arg18[%c64_112, %c0_113] : memref<144x384xf32, #tpu.memory_space<vmem>>, vector<16x128xf32>
    tpu.vector_store %arg18[%c64_112, %c0_113], %107 {strides = array<i32>} : memref<144x384xf32, #tpu.memory_space<vmem>>, vector<16x128xf32>,
    %c116_i32_114 = arith.constant 116 : i32
    %109 = tpu.dynamic_rotate %99 by %c116_i32_114 dim 1 : vector<16x128xf32>, i32 -> vector<16x128xf32>
    %c80 = arith.constant 80 : index
    %c0_115 = arith.constant 0 : index
    %110 = vector.load %arg18[%c80, %c0_115] : memref<144x384xf32, #tpu.memory_space<vmem>>, vector<16x128xf32>
    tpu.vector_store %arg18[%c80, %c0_115], %109 {strides = array<i32>} : memref<144x384xf32, #tpu.memory_space<vmem>>, vector<16x128xf32>,
    %c108_i32_116 = arith.constant 108 : i32
    %111 = tpu.dynamic_rotate %99 by %c108_i32_116 dim 1 : vector<16x128xf32>, i32 -> vector<16x128xf32>
    %c96 = arith.constant 96 : index
    %c0_117 = arith.constant 0 : index
    %112 = vector.load %arg18[%c96, %c0_117] : memref<144x384xf32, #tpu.memory_space<vmem>>, vector<16x128xf32>
    tpu.vector_store %arg18[%c96, %c0_117], %111 {strides = array<i32>} : memref<144x384xf32, #tpu.memory_space<vmem>>, vector<16x128xf32>,
    %c107_i32_118 = arith.constant 107 : i32
    %113 = tpu.dynamic_rotate %99 by %c107_i32_118 dim 1 : vector<16x128xf32>, i32 -> vector<16x128xf32>
    %c112 = arith.constant 112 : index
    %c0_119 = arith.constant 0 : index
    %114 = vector.load %arg18[%c112, %c0_119] : memref<144x384xf32, #tpu.memory_space<vmem>>, vector<16x128xf32>
    tpu.vector_store %arg18[%c112, %c0_119], %113 {strides = array<i32>} : memref<144x384xf32, #tpu.memory_space<vmem>>, vector<16x128xf32>,
    %c106_i32_120 = arith.constant 106 : i32
    %115 = tpu.dynamic_rotate %99 by %c106_i32_120 dim 1 : vector<16x128xf32>, i32 -> vector<16x128xf32>
    %c128 = arith.constant 128 : index
    %c0_121 = arith.constant 0 : index
    %116 = vector.load %arg18[%c128, %c0_121] : memref<144x384xf32, #tpu.memory_space<vmem>>, vector<16x128xf32>
    tpu.vector_store %arg18[%c128, %c0_121], %115 {strides = array<i32>} : memref<144x384xf32, #tpu.memory_space<vmem>>, vector<16x128xf32>,
    %c0_122 = arith.constant 0 : index
    %c0_123 = arith.constant 0 : index
    %117 = vector.load %arg18[%c0_122, %c0_123] : memref<144x384xf32, #tpu.memory_space<vmem>>, vector<144x128xf32>
    %118 = arith.truncf %117 : vector<144x128xf32> to vector<144x128xbf16>
    %c0_124 = arith.constant 0 : index
    %c0_125 = arith.constant 0 : index
    %119 = vector.load %arg8[%c0_124, %c0_125] : memref<16x144xbf16, #tpu.memory_space<vmem>>, vector<16x144xbf16>
    %cst_126 = arith.constant dense<0.000000e+00> : vector<16x128xf32>
    %120 = tpu.matmul %119, %118, %cst_126 {dimension_numbers = #tpu.dot_dimension_numbers<[1], [0], [0], [1], [0, 0, 1, 1], [], []>} : vector<16x144xbf16>, vector<144x128xbf16>, vector<16x128xf32> -> vector<16x128xf32>
    %c0_127 = arith.constant 0 : index
    %c0_128 = arith.constant 0 : index
    %121 = vector.load %arg9[%c0_127, %c0_128] : memref<16x1xf32, #tpu.memory_space<vmem>>, vector<16x1xf32>
    %122 = vector.broadcast %121 : vector<16x1xf32> to vector<16x128xf32>
    %123 = arith.addf %120, %122 : vector<16x128xf32>
    %cst_129 = arith.constant 0.000000e+00 : f32
    %124 = vector.broadcast %cst_129 : f32 to vector<16x128xf32>
    %125 = arith.maximumf %123, %124 : vector<16x128xf32>
    %c127_i32_130 = arith.constant 127 : i32
    %126 = tpu.dynamic_rotate %125 by %c127_i32_130 dim 1 : vector<16x128xf32>, i32 -> vector<16x128xf32>
    %127 = arith.maximumf %125, %126 : vector<16x128xf32>
    %c118_i32_131 = arith.constant 118 : i32
    %128 = tpu.dynamic_rotate %127 by %c118_i32_131 dim 1 : vector<16x128xf32>, i32 -> vector<16x128xf32>
    %129 = arith.maximumf %127, %128 : vector<16x128xf32>
    %c0_132 = arith.constant 0 : index
    %c0_133 = arith.constant 0 : index
    %130 = vector.load %arg15[%c0_132, %c0_133] : memref<128x128xf32, #tpu.memory_space<vmem>>, vector<128x128xf32>
    %cst_134 = arith.constant dense<0.000000e+00> : vector<16x128xf32>
    %131 = tpu.matmul %129, %130, %cst_134 {dimension_numbers = #tpu.dot_dimension_numbers<[1], [0], [0], [1], [0, 0, 1, 1], [], []>} : vector<16x128xf32>, vector<128x128xf32>, vector<16x128xf32> -> vector<16x128xf32>
    %c0_135 = arith.constant 0 : index
    %c0_136 = arith.constant 0 : index
    %132 = vector.load %arg17[%c0_135, %c0_136] : memref<16x384xf32, #tpu.memory_space<vmem>>, vector<16x128xf32>
    tpu.vector_store %arg17[%c0_135, %c0_136], %131 {strides = array<i32>} : memref<16x384xf32, #tpu.memory_space<vmem>>, vector<16x128xf32>,
    %c0_137 = arith.constant 0 : index
    %c0_138 = arith.constant 0 : index
    %133 = vector.load %arg17[%c0_137, %c0_138] : memref<16x384xf32, #tpu.memory_space<vmem>>, vector<16x128xf32>
    %c0_139 = arith.constant 0 : index
    %c0_140 = arith.constant 0 : index
    %134 = vector.load %arg18[%c0_139, %c0_140] : memref<144x384xf32, #tpu.memory_space<vmem>>, vector<16x128xf32>
    tpu.vector_store %arg18[%c0_139, %c0_140], %133 {strides = array<i32>} : memref<144x384xf32, #tpu.memory_space<vmem>>, vector<16x128xf32>,
    %c127_i32_141 = arith.constant 127 : i32
    %135 = tpu.dynamic_rotate %133 by %c127_i32_141 dim 1 : vector<16x128xf32>, i32 -> vector<16x128xf32>
    %c16_142 = arith.constant 16 : index
    %c0_143 = arith.constant 0 : index
    %136 = vector.load %arg18[%c16_142, %c0_143] : memref<144x384xf32, #tpu.memory_space<vmem>>, vector<16x128xf32>
    tpu.vector_store %arg18[%c16_142, %c0_143], %135 {strides = array<i32>} : memref<144x384xf32, #tpu.memory_space<vmem>>, vector<16x128xf32>,
    %c126_i32_144 = arith.constant 126 : i32
    %137 = tpu.dynamic_rotate %133 by %c126_i32_144 dim 1 : vector<16x128xf32>, i32 -> vector<16x128xf32>
    %c32_145 = arith.constant 32 : index
    %c0_146 = arith.constant 0 : index
    %138 = vector.load %arg18[%c32_145, %c0_146] : memref<144x384xf32, #tpu.memory_space<vmem>>, vector<16x128xf32>
    tpu.vector_store %arg18[%c32_145, %c0_146], %137 {strides = array<i32>} : memref<144x384xf32, #tpu.memory_space<vmem>>, vector<16x128xf32>,
    %c122_i32 = arith.constant 122 : i32
    %139 = tpu.dynamic_rotate %133 by %c122_i32 dim 1 : vector<16x128xf32>, i32 -> vector<16x128xf32>
    %c48_147 = arith.constant 48 : index
    %c0_148 = arith.constant 0 : index
    %140 = vector.load %arg18[%c48_147, %c0_148] : memref<144x384xf32, #tpu.memory_space<vmem>>, vector<16x128xf32>
    tpu.vector_store %arg18[%c48_147, %c0_148], %139 {strides = array<i32>} : memref<144x384xf32, #tpu.memory_space<vmem>>, vector<16x128xf32>,
    %c121_i32 = arith.constant 121 : i32
    %141 = tpu.dynamic_rotate %133 by %c121_i32 dim 1 : vector<16x128xf32>, i32 -> vector<16x128xf32>
    %c64_149 = arith.constant 64 : index
    %c0_150 = arith.constant 0 : index
    %142 = vector.load %arg18[%c64_149, %c0_150] : memref<144x384xf32, #tpu.memory_space<vmem>>, vector<16x128xf32>
    tpu.vector_store %arg18[%c64_149, %c0_150], %141 {strides = array<i32>} : memref<144x384xf32, #tpu.memory_space<vmem>>, vector<16x128xf32>,
    %c120_i32 = arith.constant 120 : i32
    %143 = tpu.dynamic_rotate %133 by %c120_i32 dim 1 : vector<16x128xf32>, i32 -> vector<16x128xf32>
    %c80_151 = arith.constant 80 : index
    %c0_152 = arith.constant 0 : index
    %144 = vector.load %arg18[%c80_151, %c0_152] : memref<144x384xf32, #tpu.memory_space<vmem>>, vector<16x128xf32>
    tpu.vector_store %arg18[%c80_151, %c0_152], %143 {strides = array<i32>} : memref<144x384xf32, #tpu.memory_space<vmem>>, vector<16x128xf32>,
    %c116_i32_153 = arith.constant 116 : i32
    %145 = tpu.dynamic_rotate %133 by %c116_i32_153 dim 1 : vector<16x128xf32>, i32 -> vector<16x128xf32>
    %c96_154 = arith.constant 96 : index
    %c0_155 = arith.constant 0 : index
    %146 = vector.load %arg18[%c96_154, %c0_155] : memref<144x384xf32, #tpu.memory_space<vmem>>, vector<16x128xf32>
    tpu.vector_store %arg18[%c96_154, %c0_155], %145 {strides = array<i32>} : memref<144x384xf32, #tpu.memory_space<vmem>>, vector<16x128xf32>,
    %c115_i32 = arith.constant 115 : i32
    %147 = tpu.dynamic_rotate %133 by %c115_i32 dim 1 : vector<16x128xf32>, i32 -> vector<16x128xf32>
    %c112_156 = arith.constant 112 : index
    %c0_157 = arith.constant 0 : index
    %148 = vector.load %arg18[%c112_156, %c0_157] : memref<144x384xf32, #tpu.memory_space<vmem>>, vector<16x128xf32>
    tpu.vector_store %arg18[%c112_156, %c0_157], %147 {strides = array<i32>} : memref<144x384xf32, #tpu.memory_space<vmem>>, vector<16x128xf32>,
    %c114_i32 = arith.constant 114 : i32
    %149 = tpu.dynamic_rotate %133 by %c114_i32 dim 1 : vector<16x128xf32>, i32 -> vector<16x128xf32>
    %c128_158 = arith.constant 128 : index
    %c0_159 = arith.constant 0 : index
    %150 = vector.load %arg18[%c128_158, %c0_159] : memref<144x384xf32, #tpu.memory_space<vmem>>, vector<16x128xf32>
    tpu.vector_store %arg18[%c128_158, %c0_159], %149 {strides = array<i32>} : memref<144x384xf32, #tpu.memory_space<vmem>>, vector<16x128xf32>,
    %c0_160 = arith.constant 0 : index
    %c0_161 = arith.constant 0 : index
    %151 = vector.load %arg18[%c0_160, %c0_161] : memref<144x384xf32, #tpu.memory_space<vmem>>, vector<144x128xf32>
    %152 = arith.truncf %151 : vector<144x128xf32> to vector<144x128xbf16>
    %c0_162 = arith.constant 0 : index
    %c0_163 = arith.constant 0 : index
    %153 = vector.load %arg10[%c0_162, %c0_163] : memref<32x144xbf16, #tpu.memory_space<vmem>>, vector<32x144xbf16>
    %cst_164 = arith.constant dense<0.000000e+00> : vector<32x128xf32>
    %154 = tpu.matmul %153, %152, %cst_164 {dimension_numbers = #tpu.dot_dimension_numbers<[1], [0], [0], [1], [0, 0, 1, 1], [], []>} : vector<32x144xbf16>, vector<144x128xbf16>, vector<32x128xf32> -> vector<32x128xf32>
    %c0_165 = arith.constant 0 : index
    %c0_166 = arith.constant 0 : index
    %155 = vector.load %arg11[%c0_165, %c0_166] : memref<32x1xf32, #tpu.memory_space<vmem>>, vector<32x1xf32>
    %156 = vector.broadcast %155 : vector<32x1xf32> to vector<32x128xf32>
    %157 = arith.addf %154, %156 : vector<32x128xf32>
    %cst_167 = arith.constant 0.000000e+00 : f32
    %158 = vector.broadcast %cst_167 : f32 to vector<32x128xf32>
    %159 = arith.maximumf %157, %158 : vector<32x128xf32>
    %c0_168 = arith.constant 0 : index
    %c0_169 = arith.constant 0 : index
    %c0_170 = arith.constant 0 : index
    %160 = vector.load %arg16[%c0_168, %c0_169, %c0_170] : memref<1x32x128xf32, #tpu.memory_space<vmem>>, vector<1x32x128xf32>
    %161 = vector.shape_cast %160 : vector<1x32x128xf32> to vector<32x128xf32>
    %162 = vector.shape_cast %159 : vector<32x128xf32> to vector<1x32x128xf32>
    tpu.vector_store %arg16[%c0_168, %c0_169, %c0_170], %162 {strides = array<i32>} : memref<1x32x128xf32, #tpu.memory_space<vmem>>, vector<1x32x128xf32>,
    return
  }
  func.func @transform_0(%arg0: i32) -> (i32, i32, i32) {
    %c0_i32 = arith.constant 0 : i32
    %c0_i32_0 = arith.constant 0 : i32
    %c0_i32_1 = arith.constant 0 : i32
    return %arg0, %c0_i32, %c0_i32_0 : i32, i32, i32
  }
  func.func @transform_1(%arg0: i32) -> (i32, i32) {
    %c0_i32 = arith.constant 0 : i32
    %c0_i32_0 = arith.constant 0 : i32
    %c0_i32_1 = arith.constant 0 : i32
    return %c0_i32, %c0_i32_0 : i32, i32
  }
  func.func @transform_2(%arg0: i32) -> (i32, i32) {
    %c0_i32 = arith.constant 0 : i32
    %c0_i32_0 = arith.constant 0 : i32
    %c0_i32_1 = arith.constant 0 : i32
    return %c0_i32, %c0_i32_0 : i32, i32
  }
  func.func @transform_3(%arg0: i32) -> (i32, i32) {
    %c0_i32 = arith.constant 0 : i32
    %c0_i32_0 = arith.constant 0 : i32
    %c0_i32_1 = arith.constant 0 : i32
    return %c0_i32, %c0_i32_0 : i32, i32
  }
  func.func @transform_4(%arg0: i32) -> (i32, i32) {
    %c0_i32 = arith.constant 0 : i32
    %c0_i32_0 = arith.constant 0 : i32
    %c0_i32_1 = arith.constant 0 : i32
    return %c0_i32, %c0_i32_0 : i32, i32
  }
  func.func @transform_5(%arg0: i32) -> (i32, i32) {
    %c0_i32 = arith.constant 0 : i32
    %c0_i32_0 = arith.constant 0 : i32
    %c0_i32_1 = arith.constant 0 : i32
    return %c0_i32, %c0_i32_0 : i32, i32
  }
  func.func @transform_6(%arg0: i32) -> (i32, i32) {
    %c0_i32 = arith.constant 0 : i32
    %c0_i32_0 = arith.constant 0 : i32
    %c0_i32_1 = arith.constant 0 : i32
    return %c0_i32, %c0_i32_0 : i32, i32
  }
  func.func @transform_7(%arg0: i32) -> (i32, i32) {
    %c0_i32 = arith.constant 0 : i32
    %c0_i32_0 = arith.constant 0 : i32
    %c0_i32_1 = arith.constant 0 : i32
    return %c0_i32, %c0_i32_0 : i32, i32
  }
  func.func @transform_8(%arg0: i32) -> (i32, i32) {
    %c0_i32 = arith.constant 0 : i32
    %c0_i32_0 = arith.constant 0 : i32
    %c0_i32_1 = arith.constant 0 : i32
    return %c0_i32, %c0_i32_0 : i32, i32
  }
  func.func @transform_9(%arg0: i32) -> (i32, i32) {
    %c0_i32 = arith.constant 0 : i32
    %c0_i32_0 = arith.constant 0 : i32
    %c0_i32_1 = arith.constant 0 : i32
    return %c0_i32, %c0_i32_0 : i32, i32
  }
  func.func @transform_10(%arg0: i32) -> (i32, i32) {
    %c0_i32 = arith.constant 0 : i32
    %c0_i32_0 = arith.constant 0 : i32
    %c0_i32_1 = arith.constant 0 : i32
    return %c0_i32, %c0_i32_0 : i32, i32
  }
  func.func @transform_11(%arg0: i32) -> (i32, i32) {
    %c0_i32 = arith.constant 0 : i32
    %c0_i32_0 = arith.constant 0 : i32
    %c0_i32_1 = arith.constant 0 : i32
    return %c0_i32, %c0_i32_0 : i32, i32
  }
  func.func @transform_12(%arg0: i32) -> (i32, i32) {
    %c0_i32 = arith.constant 0 : i32
    %c0_i32_0 = arith.constant 0 : i32
    %c0_i32_1 = arith.constant 0 : i32
    return %c0_i32, %c0_i32_0 : i32, i32
  }
  func.func @transform_13(%arg0: i32) -> (i32, i32) {
    %c0_i32 = arith.constant 0 : i32
    %c0_i32_0 = arith.constant 0 : i32
    %c0_i32_1 = arith.constant 0 : i32
    return %c0_i32, %c0_i32_0 : i32, i32
  }
  func.func @transform_14(%arg0: i32) -> (i32, i32) {
    %c0_i32 = arith.constant 0 : i32
    %c0_i32_0 = arith.constant 0 : i32
    %c0_i32_1 = arith.constant 0 : i32
    return %c0_i32, %c0_i32_0 : i32, i32
  }
  func.func @transform_15(%arg0: i32) -> (i32, i32, i32) {
    %c0_i32 = arith.constant 0 : i32
    %c0_i32_0 = arith.constant 0 : i32
    %c0_i32_1 = arith.constant 0 : i32
    return %arg0, %c0_i32, %c0_i32_0 : i32, i32, i32
  }
}

</mosaic_0001>

<bundles_post_ra>
// kernel: tpu_custom_call.1
= control target key start
LH: loop header
LB: loop body
LE: loop exit
PB: predicated region body
PF: predicated region fallthrough
CT: control target
= control target key end

     0   :  { %s2738_s0 = inlined_call_operand.vmem [shape: f32[2,8,384], index: 0, kind: input, shape index: {}]   ;;  %s2739_s1 = inlined_call_operand.vmem [shape: bf16[8,72], index: 1, kind: input, shape index: {}]   ;;  %s2740_s2 = inlined_call_operand.vmem [shape: f32[8,1], index: 2, kind: input, shape index: {}]   ;;  %s2741_s3 = inlined_call_operand.vmem [shape: bf16[8,72], index: 3, kind: input, shape index: {}]   ;;  %s2742_s4 = inlined_call_operand.vmem [shape: f32[8,1], index: 4, kind: input, shape index: {}]   ;;  %s2743_s5 = inlined_call_operand.vmem [shape: bf16[16,72], index: 5, kind: input, shape index: {}]   ;;  %s2744_s6 = inlined_call_operand.vmem [shape: f32[16,1], index: 6, kind: input, shape index: {}]   ;;  %s2745_s7 = inlined_call_operand.vmem [shape: bf16[16,144], index: 7, kind: input, shape index: {}]   ;;  %s2746_s8 = inlined_call_operand.vmem [shape: f32[16,1], index: 8, kind: input, shape index: {}]   ;;  %s2747_s9 = inlined_call_operand.hbm [shape: bf16[32,144], index: 9, kind: input, shape index: {}]   ;;  %s2748_s10 = inlined_call_operand.vmem [shape: f32[32,1], index: 10, kind: input, shape index: {}]   ;;  %s2749_s11 = inlined_call_operand.vmem [shape: f32[1,384], index: 11, kind: input, shape index: {}]   ;;  %s2750_s12 = inlined_call_operand.vmem [shape: f32[1,128], index: 12, kind: input, shape index: {}]   ;;  %s2751_s13 = inlined_call_operand.hbm [shape: f32[384,128], index: 13, kind: input, shape index: {}]   ;;  %s2752_s14 = inlined_call_operand.hbm [shape: f32[128,128], index: 14, kind: input, shape index: {}]   ;;  %s2753_s15 = inlined_call_operand.hbm [shape: f32[2,32,128], index: 15, kind: output, shape index: {}]  }
   0x1   :  { %2762 = sst [smem:[#allocation21_spill]] %s2747_s9 }
   0x2   :  { %2763 = sst [smem:[#allocation22_spill]] %s2751_s13 }
   0x3   :  { %20 = vsyncpa [#allocation5], 0 }
   0x4   :  { %21 = vsyncpa [#allocation8], 0 }
   0x5   :  { %22 = vsyncpa [#allocation6], 0 }
   0x6   :  { %24 = vsyncpa [#allocation6 + $0x1], 0  ;;  %s2294_s18 = smov 0   ;;  %s2296_s19 = smov 0  }
   0x7   :  { %s2298_s20 = smov 0   ;;  %s2300_s21 = smov 0  }
   0x8 LB: > { %2764 = sst [smem:[#allocation14_spill]] %s2172_s18  ;;  %s2315_s22 = sadd.s32 4294967295, %s2184_s21   ;;  %s2184_s21 = sphi %s2300_s21, %s2781_s21   ;;  %s2180_s20 = sphi %s2298_s20, %s2783_s20   ;;  %s2176_s19 = sphi %s2296_s19, %s2785_s19   ;;  %s2172_s18 = sphi %s2294_s18, %s2784_s18  }
   0x9   : > { %2765 = sst [smem:[#allocation15_spill]] %s2180_s20  ;;  %s1691_s23 = sadd.s32 4294967294, %s2184_s21  }
   0xa   : > { %2766 = sst [smem:[#allocation16_spill]] %s2184_s21  ;;  %s2319_s24 = sadd.s32 1, %s2184_s21  }
   0xb   : > { %2767 = sst [smem:[#allocation17_spill]] %s2319_s24  ;;  %s357_s25 = sadd.s32 1, %s2180_s20 }
   0xc   : > { %s354_s26 = ssub.s32 %s2184_s21, %s2319_s24  ;;  %p367_p0 = scmp.ne.s32.totalorder %s2180_s20, %s2176_s19 }
   0xd   : > { %p355_p1 = scmp.eq.s32.totalorder %s354_s26, 0  ;;  %p368_p2 = scmp.eq.s32.totalorder %s2315_s22, 1 }
   0xe   : > { %p373_p3 = scmp.ne.s32.totalorder %s2176_s19, %s2172_s18  ;;  %p374_p4 = scmp.eq.s32.totalorder %s1691_s23, 1 }
   0xf   : > { %s2330_s27 = scalar_select %p355_p1, %s2180_s20, %s357_s25  }
  0x10   : > { %p2332_p5 = por %p368_p2, %p367_p0  ;;  %p2336_p6 = por %p374_p4, %p373_p3 }
  0x11   : > { %2768 = sst [smem:[#allocation18_spill]] %s2330_s27  ;;  %p1692_p7 = scmp.ge.s32.totalorder %s2184_s21, 1 }
  0x12   : > { %s2769_s28 = scalar_select %p2332_p5, 1, 0 }
  0x13   : > { %s2771_s29 = scalar_select %p2336_p6, 1, 0 }
  0x14   : > { %2770 = sst [smem:[#allocation19_spill]] %s2769_s28  ;;  %p381_p8 = scmp.lt.s32.totalorder %s2184_s21, 3 }
  0x15   : > { %2772 = sst [smem:[#allocation20_spill]] %s2771_s29  ;;  %p1783_p9 = scmp.eq.s32.totalorder %s2315_s22, 0 }
  0x16   : > { %p2343_p10 = pnand %p1692_p7, %p381_p8  ;;  %s2774_s13 = sld [smem:[#allocation22_spill]] }
  0x17   : > { %s2775_s9 = sld [smem:[#allocation21_spill]]  ;;  %s2186_s24 = smov [#allocation7]  }
  0x18   : > { %p1769_p11 = pneg %p2343_p10  ;;  %s441_s29 = sshll.u32 %s2186_s24, 4  ;;  %s442_s29 = int_to_ptr.vmem [resolvable:$true] %s441_s29 }
  0x19   : > { %s2187_s16 = smov 128   ;;  %s2188_s17 = smov 8  }
  0x1a   : > { %p2357_p12 = pnand %p1783_p9, %p1769_p11  ;;  %s2190_s21 = smov [#allocation9]  }
  0x1b   : > { %s455_s28 = sshll.u32 %s2190_s21, 4  ;;  %s456_s28 = int_to_ptr.vmem [resolvable:$true] %s455_s28 }
  0x1c   : > { %s439_s23 = sshll.u32 %s2774_s13, 4  ;;  %s2189_s13 = smov [#allocation4]   ;;  %s440_s23 = int_to_ptr.hbm [resolvable:$true] %s439_s23 }
  0x1d   : > { %s416_s27 = sshll.u32 %s2775_s9, 4  ;;  %s418_s18 = sshll.u32 %s2189_s13, 4  ;;  %s417_s27 = int_to_ptr.hbm [resolvable:$true] %s416_s27  ;;  %s419_s18 = int_to_ptr.vmem [resolvable:$true] %s418_s18 }
  0x1e   : > { %1775 = dma.hbm_to_vmem [thread:$0]  (!%p2357_p12), %s440_s23, 6144, %s442_s29, [#allocation8], %s2187_s16, %s2187_s16, %s2188_s17  }
  0x1f   : > { %s453_s9 = sshll.u32 %s2752_s14, 4  ;;  %479 = sbr.rel (%p2343_p10) target bundleno = 2503 (0x9c7), region = 80  ;;  %s454_s9 = int_to_ptr.hbm [resolvable:$true] %s453_s9 }
  0x20   : > { %1772 = dma.hbm_to_vmem [thread:$0]  (!%p2357_p12), %s417_s27, 512, %s419_s18, [#allocation5], %s2187_s16, %s2187_s16, %s2188_s17  }
  0x21   : > { %1778 = dma.hbm_to_vmem [thread:$0]  (!%p2357_p12), %s454_s9, 2048, %s456_s28, [#allocation8], %s2187_s16, %s2187_s16, %s2188_s17  }
  0x24   : > { %2159 = dma.done.wait (%p1783_p9), [#allocation5], 512  }
  0x25   : > { %2161 = vsyncadd (%p1783_p9), [#allocation5], 4294966784 }
  0x26   : > { %2163 = dma.done.wait (%p1783_p9), [#allocation8], 8192  }
  0x27   : > { %2165 = vsyncadd (%p1783_p9), [#allocation8], 4294959104  ;;  %p538_p13 = scmp.lt.s32.totalorder %s2315_s22, 1  ;;  %s2191_s24 = smov 91   ;;  %v556_v5 = vlaneseq  ;;  %vm709_vm1 = vcmask 1043456   ;;  %v699_v37 = vld [vmem:[%s2740_s2] sm:$0xff] }
  0x28   : > { %s2192_s27 = smov 90   ;;  %s2193_s28 = smov 109   ;;  %v2199_v41 = vmov 0   ;;  %vm705_vm9 = vcmask 588800   ;;  %vm1318_vm11 = vcmask 130048  }
  0x29   : > { %s539_s13 = scalar_select %p538_p13, %s2315_s22, 1  ;;  %v2419_v6 = vand.u32 127, %v556_v5  ;;  %1890 = vset.pattern.permute.xlu1 %v2199_v41  ;;  %1931 = vset.pattern.permute.xlu0 %v2199_v41 }
  0x2a   : > { %s2194_s29 = smov 92   ;;  %s2195_s30 = smov 108   ;;  %1942 = vset.pattern.permute.xlu2 %v2199_v41 }
  0x2b   : > { %s1754_s9 = smul.u32 24, %s539_s13  ;;  %s2196_s23 = smov 126   ;;  %vm649_vm0 = vcmp.lt.s32.totalorder %v2419_v6, 90  ;;  %vm636_vm2 = vcmp.lt.s32.totalorder %v2419_v6, 91  ;;  %vm623_vm3 = vcmp.lt.s32.totalorder %v2419_v6, 92  ;;  %vm610_vm4 = vcmp.lt.s32.totalorder %v2419_v6, 108 }
  0x2c   : > { %s2197_s16 = smov 110   ;;  %s2198_s17 = smov 127   ;;  %vm597_vm5 = vcmp.lt.s32.totalorder %v2419_v6, 109  ;;  %vm584_vm6 = vcmp.lt.s32.totalorder %v2419_v6, 110  ;;  %vm571_vm7 = vcmp.lt.s32.totalorder %v2419_v6, 126  ;;  %vm558_vm8 = vcmp.lt.s32.totalorder %v2419_v6, 127 }
  0x2d   : > { %s542_s21 = scalar_lea.vmem %s2738_s0, %s1754_s9  ;;  %s2200_s18 = smov 19   ;;  %vm767_vm10 = vcmp.lt.s32.totalorder %v2419_v6, 19  ;;  %v1166_v6 = vld [vmem:[%s2744_s6 + $0x8] sm:$0xff] }
  0x2e   : > { %v2385_v0 = vld [vmem:[%s542_s21] sm:$0xff]  ;;  %v2387_v1 = vld [vmem:[%s542_s21 + $0x10] sm:$0xff]  ;;  %v2394_v3 = vld [vmem:[%s542_s21 + $0x8] sm:$0xff]  ;;  %s2202_s25 = smov 106   ;;  %s2203_s26 = smov 116  }
  0x2f   : > { %v1860_v2 = vpack.i.bf16 %v2387_v1, %v2385_v0  ;;  %s2204_s13 = smov 117   ;;  %s2205_s9 = smov 118  }
  0x30   : > { %s2134_s20 = scalar_lea.hbm %s2753_s15, 64 }
  0x31   : > { %1861 = vrot.lane.b32.xlu1 %v1860_v2, %s2191_s24  ;;  %1851 = vrot.lane.b32.xlu0 %v1860_v2, %s2192_s27 }
  0x32   : > { %1866 = vrot.lane.b32.xlu2 %v1860_v2, %s2193_s28 }
  0x39   : > { %645 = vrot.lane.b32.xlu1 %v2394_v3, %s2192_s27  ;;  %1856 = vrot.lane.b32.xlu0 %v1860_v2, %s2194_s29 }
  0x3a   : > { %1871 = vrot.lane.b32.xlu2 %v1860_v2, %s2195_s30 }
  0x41   : > { %632 = vrot.lane.b32.xlu1 %v2394_v3, %s2191_s24  ;;  %619 = vrot.lane.b32.xlu0 %v2394_v3, %s2194_s29 }
  0x42   : > { %1876 = vrot.lane.b32.xlu2 %v1860_v2, %s2196_s23 }
  0x49   : > { %593 = vrot.lane.b32.xlu1 %v2394_v3, %s2193_s28  ;;  %1881 = vrot.lane.b32.xlu0 %v1860_v2, %s2197_s16 }
  0x4a   : > { %606 = vrot.lane.b32.xlu2 %v2394_v3, %s2195_s30 }
  0x51   : > { %567 = vrot.lane.b32.xlu1 %v2394_v3, %s2196_s23  ;;  %1886 = vrot.lane.b32.xlu0 %v1860_v2, %s2198_s17 }
  0x52   : > { %580 = vrot.lane.b32.xlu2 %v2394_v3, %s2197_s16 }
  0x59   : > { %552 = vrot.lane.b32.xlu0 %v2394_v3, %s2198_s17  ;;  %702 = vperm.xlu1 %1890, %v699_v37  }
  0x8c   : > { %v2417_v4 = vpop.permute.xlu2 %1866 }
  0x8d   : > { %v1869_v15 = vunpack.i.h.bf16 %v2417_v4  ;;  %v1868_v18 = vunpack.i.l.bf16 %v2417_v4 }
  0x8f   : > { %v600_v35 = vsel %vm597_vm5, %v1869_v15, %v1868_v18 }
  0x94   : > { %v1872_v9 = vpop.permute.xlu2 %1871 }
  0x95   : > { %v1874_v19 = vunpack.i.h.bf16 %v1872_v9  ;;  %v1873_v20 = vunpack.i.l.bf16 %v1872_v9 }
  0x97   : > { %v613_v36 = vsel %vm610_vm4, %v1874_v19, %v1873_v20 }
  0x98   : > { %v691_v40 = vpack.c.bf16 %v613_v36, %v600_v35 }
  0x9c   : > { %v1877_v29 = vpop.permute.xlu2 %1876 }
  0x9d   : > { %v1879_v49 = vunpack.i.h.bf16 %v1877_v29  ;;  %v1878_v50 = vunpack.i.l.bf16 %v1877_v29 }
  0x9f   : > { %v574_v61 = vsel %vm571_vm7, %v1879_v49, %v1878_v50 }
  0xa3   : > { %v1862_v7 = vpop.permute.xlu1 %1861  ;;  %v1852_v8 = vpop.permute.xlu0 %1851 }
  0xa4   : > { %v1854_v10 = vunpack.i.h.bf16 %v1852_v8  ;;  %v1853_v11 = vunpack.i.l.bf16 %v1852_v8  ;;  %v1864_v16 = vunpack.i.h.bf16 %v1862_v7  ;;  %v1863_v17 = vunpack.i.l.bf16 %v1862_v7  ;;  %v607_v48 = vpop.permute.xlu2 %606 }
  0xa5   : > { %v611_v51 = vsel %vm610_vm4, %v607_v48, %v1874_v19  ;;  %v612_v52 = vsel %vm610_vm4, %v1873_v20, %v607_v48 }
  0xa6   : > { %v652_v12 = vsel %vm649_vm0, %v1854_v10, %v1853_v11  ;;  %v639_v31 = vsel %vm636_vm2, %v1864_v16, %v1863_v17 }
  0xa7   : > { %v697_v13 = vpack.c.bf16 %v652_v12, %v652_v12 }
  0xa9   : > { %v717_v14 = vsel %vm709_vm1, %v697_v13, 0 }
  0xaa   : > { %748 = vmatpush.bf16.msra.mxu2 %v717_v14 }
  0xab   : > { %v646_v21 = vpop.permute.xlu1 %645  ;;  %v1857_v22 = vpop.permute.xlu0 %1856 }
  0xac   : > { %v650_v23 = vsel %vm649_vm0, %v646_v21, %v1854_v10  ;;  %v651_v24 = vsel %vm649_vm0, %v1853_v11, %v646_v21  ;;  %v1859_v25 = vunpack.i.h.bf16 %v1857_v22  ;;  %v1858_v26 = vunpack.i.l.bf16 %v1857_v22  ;;  %v581_v2 = vpop.permute.xlu2 %580 }
  0xad   : > { %v695_v27 = vpack.c.bf16 %v651_v24, %v651_v24  ;;  %v696_v28 = vpack.c.bf16 %v650_v23, %v650_v23 }
  0xae   : > { %v626_v30 = vsel %vm623_vm3, %v1859_v25, %v1858_v26 }
  0xaf   : > { %v711_v32 = vsel %vm709_vm1, %v695_v27, 0  ;;  %v714_v33 = vsel %vm709_vm1, %v696_v28, 0  ;;  %v694_v34 = vpack.c.bf16 %v639_v31, %v626_v30 }
  0xb0   : > { %722 = vmatpush.bf16.msra.mxu0 %v711_v32  ;;  %735 = vmatpush.bf16.msra.mxu1 %v714_v33  ;;  %v771_v33 = vld [vmem:[%s2749_s11] sm:$0x7] }
  0xb1   : > { %749 = vmatpush.bf16.msra.mxu2 %v694_v34  ;;  %v774_v34 = vperm.slane %v771_v33, 1  ;;  %v773_v35 = vperm.slane %v771_v33, 0 }
  0xb3   : > { %v633_v38 = vpop.permute.xlu1 %632  ;;  %v620_v39 = vpop.permute.xlu0 %619 }
  0xb4   : > { %v637_v42 = vsel %vm636_vm2, %v633_v38, %v1864_v16  ;;  %v638_v43 = vsel %vm636_vm2, %v1863_v17, %v633_v38  ;;  %v624_v44 = vsel %vm623_vm3, %v620_v39, %v1859_v25  ;;  %v625_v45 = vsel %vm623_vm3, %v1858_v26, %v620_v39  ;;  %v698_v17 = vld [vmem:[%s2739_s1] sm:$0xf] }
  0xb5   : > { %750 = vmatpush.bf16.msra.mxu2 %v691_v40  ;;  %v692_v46 = vpack.c.bf16 %v638_v43, %v625_v45  ;;  %v693_v47 = vpack.c.bf16 %v637_v42, %v624_v44  ;;  %v775_v44 = vperm.slane %v771_v33, 2 }
  0xb7   : > { %723 = vmatpush.bf16.msra.mxu0 %v692_v46  ;;  %736 = vmatpush.bf16.msra.mxu1 %v693_v47 }
  0xbb   : > { %v594_v53 = vpop.permute.xlu1 %593  ;;  %v1882_v54 = vpop.permute.xlu0 %1881 }
  0xbc   : > { %v598_v55 = vsel %vm597_vm5, %v594_v53, %v1869_v15  ;;  %v599_v56 = vsel %vm597_vm5, %v1868_v18, %v594_v53  ;;  %v1884_v57 = vunpack.i.h.bf16 %v1882_v54  ;;  %v1883_v58 = vunpack.i.l.bf16 %v1882_v54 }
  0xbd   : > { %v689_v59 = vpack.c.bf16 %v612_v52, %v599_v56  ;;  %v690_v60 = vpack.c.bf16 %v611_v51, %v598_v55 }
  0xbe   : > { %v587_v62 = vsel %vm584_vm6, %v1884_v57, %v1883_v58  ;;  %v585_v4 = vsel %vm584_vm6, %v581_v2, %v1884_v57  ;;  %v586_v5 = vsel %vm584_vm6, %v1883_v58, %v581_v2 }
  0xbf   : > { %724 = vmatpush.bf16.msra.mxu0 %v689_v59  ;;  %737 = vmatpush.bf16.msra.mxu1 %v690_v60  ;;  %v688_v63 = vpack.c.bf16 %v587_v62, %v574_v61 }
  0xc1   : > { %751 = vmatpush.bf16.msra.mxu2 %v688_v63 }
  0xc3   : > { %v568_v7 = vpop.permute.xlu1 %567  ;;  %v1887_v8 = vpop.permute.xlu0 %1886 }
  0xc4   : > { %v572_v9 = vsel %vm571_vm7, %v568_v7, %v1879_v49  ;;  %v573_v10 = vsel %vm571_vm7, %v1878_v50, %v568_v7  ;;  %v1889_v11 = vunpack.i.h.bf16 %v1887_v8  ;;  %v1888_v12 = vunpack.i.l.bf16 %v1887_v8 }
  0xc5   : > { %v686_v13 = vpack.c.bf16 %v586_v5, %v573_v10  ;;  %v687_v14 = vpack.c.bf16 %v585_v4, %v572_v9 }
  0xc6   : > { %v561_v15 = vsel %vm558_vm8, %v1889_v11, %v1888_v12 }
  0xc7   : > { %725 = vmatpush.bf16.msra.mxu0 %v686_v13  ;;  %738 = vmatpush.bf16.msra.mxu1 %v687_v14  ;;  %v685_v16 = vpack.c.bf16 %v561_v15, %v2387_v1 }
  0xc9   : > { %752 = vmatpush.bf16.msra.mxu2 %v685_v16 }
  0xcb   : > { %v553_v18 = vpop.permute.xlu0 %552  ;;  %v703_v1 = vpop.permute.xlu1 %702 }
  0xcc   : > { %v559_v19 = vsel %vm558_vm8, %v553_v18, %v1889_v11  ;;  %v560_v20 = vsel %vm558_vm8, %v1888_v12, %v553_v18  ;;  %1705 = vmatmul.msk.bf16.vlgmr.msra.gmra.mxu2 %vm705_vm9, %v698_v17 }
  0xcd   : > { %v683_v21 = vpack.c.bf16 %v560_v20, %v2385_v0  ;;  %v684_v22 = vpack.c.bf16 %v559_v19, %v2394_v3  ;;  %v930_v19 = vld [vmem:[%s2742_s4] sm:$0xff] }
  0xcf   : > { %726 = vmatpush.bf16.msra.mxu0 %v683_v21  ;;  %739 = vmatpush.bf16.msra.mxu1 %v684_v22 }
  0xd2   : > { %1703 = vmatmul.msk.bf16.vlgmr.msra.gmra.mxu0 %vm705_vm9, %v698_v17  ;;  %1704 = vmatmul.msk.bf16.vlgmr.msra.gmra.mxu1 %vm705_vm9, %v698_v17 }
 0x14f   : > { %v728_v23 = vpop.f32.mrf.mxu0  ;;  %v741_v24 = vpop.f32.mrf.mxu1 }
 0x150   : > { %v729_v25 = vadd.f32 %v728_v23, %v703_v1  ;;  %v742_v26 = vadd.f32 %v741_v24, %v703_v1  ;;  %v754_v27 = vpop.f32.mrf.mxu2 }
 0x151   : > { %v755_v28 = vadd.f32 %v754_v27, %v703_v1 }
 0x152   : > { %v758_v29 = vmax.f32 %v729_v25, 0.0  ;;  %v759_v30 = vmax.f32 %v742_v26, 0.0 }
 0x153   : > { %v760_v31 = vmax.f32 %v755_v28, 0.0 }
 0x154   : > { %763 = vrot.lane.b32.xlu0 %v759_v30, %s2200_s18  ;;  %761 = vrot.lane.b32.xlu2 %v758_v29, %s2200_s18 }
 0x155   : > { %765 = vrot.lane.b32.xlu1 %v760_v31, %s2200_s18 }
 0x157   : > { %v743_v0 = vpop.f32.mrf.mxu1  ;;  %v730_v3 = vpop.f32.mrf.mxu0 }
 0x158   : > { %v756_v32 = vpop.f32.mrf.mxu2 }
 0x1ae   : > { %v762_v36 = vpop.permute.xlu2 %761 }
 0x1c6   : > { %v764_v37 = vpop.permute.xlu0 %763 }
 0x1c7   : > { %v769_v38 = vsel %vm767_vm10, %v762_v36, %v764_v37  ;;  %v766_v39 = vpop.permute.xlu1 %765 }
 0x1c8   : > { %v2498_v40 = vmul.f32 %v774_v34, %v769_v38  ;;  %v770_v41 = vsel %vm767_vm10, %v766_v39, %v762_v36  ;;  %v768_v45 = vsel %vm767_vm10, %v764_v37, %v766_v39 }
 0x1c9   : > { %v2500_v42 = vmul.f32 %v773_v35, %v770_v41  ;;  %v2507_v46 = vmul.f32 %v775_v44, %v768_v45 }
 0x1cb   : > { %v1901_v43 = vpack.i.bf16 %v2498_v40, %v2500_v42 }
 0x1cd   : > { %1902 = vrot.lane.b32.xlu1 %v1901_v43, %s2191_s24  ;;  %1897 = vrot.lane.b32.xlu0 %v1901_v43, %s2194_s29 }
 0x1ce   : > { %1892 = vrot.lane.b32.xlu2 %v1901_v43, %s2192_s27 }
 0x1d5   : > { %1912 = vrot.lane.b32.xlu1 %v1901_v43, %s2195_s30  ;;  %1907 = vrot.lane.b32.xlu0 %v1901_v43, %s2193_s28 }
 0x1d6   : > { %879 = vrot.lane.b32.xlu2 %v2507_v46, %s2192_s27  ;;  %s2209_s27 = smov 122  }
 0x1dd   : > { %1917 = vrot.lane.b32.xlu1 %v1901_v43, %s2196_s23  ;;  %867 = vrot.lane.b32.xlu0 %v2507_v46, %s2191_s24  ;;  %s2208_s24 = smov 115  }
 0x1de   : > { %855 = vrot.lane.b32.xlu2 %v2507_v46, %s2194_s29  ;;  %s2206_s29 = smov 11  }
 0x1e5   : > { %843 = vrot.lane.b32.xlu1 %v2507_v46, %s2195_s30  ;;  %831 = vrot.lane.b32.xlu0 %v2507_v46, %s2193_s28 }
 0x1e6   : > { %1922 = vrot.lane.b32.xlu2 %v1901_v43, %s2197_s16 }
 0x1ed   : > { %819 = vrot.lane.b32.xlu1 %v2507_v46, %s2197_s16  ;;  %807 = vrot.lane.b32.xlu0 %v2507_v46, %s2196_s23 }
 0x1ee   : > { %1927 = vrot.lane.b32.xlu2 %v1901_v43, %s2198_s17 }
 0x1f5   : > { %933 = vperm.xlu0 %1931, %v930_v19  }
 0x1f6   : > { %795 = vrot.lane.b32.xlu2 %v2507_v46, %s2198_s17 }
 0x228   : > { %v1893_v47 = vpop.permute.xlu2 %1892 }
 0x229   : > { %v1895_v48 = vunpack.i.h.bf16 %v1893_v47  ;;  %v1894_v49 = vunpack.i.l.bf16 %v1893_v47 }
 0x22b   : > { %v882_v50 = vsel %vm649_vm0, %v1894_v49, %v1895_v48 }
 0x22c   : > { %v926_v51 = vpack.c.bf16 %v882_v50, %v882_v50 }
 0x22e   : > { %v940_v52 = vsel %vm709_vm1, %v926_v51, 0 }
 0x22f   : > { %951 = vmatpush.bf16.msra.mxu3 %v940_v52 }
 0x230   : > { %v880_v53 = vpop.permute.xlu2 %879 }
 0x231   : > { %v881_v54 = vsel %vm649_vm0, %v1895_v48, %v880_v53  ;;  %v883_v55 = vsel %vm649_vm0, %v880_v53, %v1894_v49  ;;  %v929_v49 = vld [vmem:[%s2741_s3] sm:$0xf] }
 0x232   : > { %v927_v56 = vpack.c.bf16 %v881_v54, %v881_v54  ;;  %v928_v57 = vpack.c.bf16 %v883_v55, %v883_v55 }
 0x234   : > { %v943_v58 = vsel %vm709_vm1, %v927_v56, 0  ;;  %v946_v59 = vsel %vm709_vm1, %v928_v57, 0 }
 0x235   : > { %964 = vmatpush.bf16.msrb.mxu0 %v943_v58  ;;  %977 = vmatpush.bf16.msrb.mxu1 %v946_v59 }
 0x238   : > { %v856_v60 = vpop.permute.xlu2 %855 }
 0x23f   : > { %v1903_v61 = vpop.permute.xlu1 %1902  ;;  %v1898_v62 = vpop.permute.xlu0 %1897 }
 0x240   : > { %v1905_v63 = vunpack.i.h.bf16 %v1903_v61  ;;  %v1904_v2 = vunpack.i.l.bf16 %v1903_v61  ;;  %v1900_v4 = vunpack.i.h.bf16 %v1898_v62  ;;  %v1899_v5 = vunpack.i.l.bf16 %v1898_v62  ;;  %v1923_v7 = vpop.permute.xlu2 %1922 }
 0x241   : > { %v1925_v22 = vunpack.i.h.bf16 %v1923_v7  ;;  %v1924_v1 = vunpack.i.l.bf16 %v1923_v7 }
 0x242   : > { %v858_v8 = vsel %vm623_vm3, %v1899_v5, %v1900_v4  ;;  %v870_v9 = vsel %vm636_vm2, %v1904_v2, %v1905_v63  ;;  %v857_v27 = vsel %vm623_vm3, %v1900_v4, %v856_v60  ;;  %v859_v28 = vsel %vm623_vm3, %v856_v60, %v1899_v5 }
 0x243   : > { %v923_v10 = vpack.c.bf16 %v870_v9, %v858_v8  ;;  %v822_v34 = vsel %vm584_vm6, %v1924_v1, %v1925_v22 }
 0x245   : > { %952 = vmatpush.bf16.msra.mxu3 %v923_v10 }
 0x247   : > { %v1913_v11 = vpop.permute.xlu1 %1912  ;;  %v1908_v12 = vpop.permute.xlu0 %1907 }
 0x248   : > { %v1915_v13 = vunpack.i.h.bf16 %v1913_v11  ;;  %v1914_v14 = vunpack.i.l.bf16 %v1913_v11  ;;  %v1910_v15 = vunpack.i.h.bf16 %v1908_v12  ;;  %v1909_v16 = vunpack.i.l.bf16 %v1908_v12  ;;  %v1928_v21 = vpop.permute.xlu2 %1927 }
 0x249   : > { %v1930_v23 = vunpack.i.h.bf16 %v1928_v21  ;;  %v1929_v24 = vunpack.i.l.bf16 %v1928_v21 }
 0x24a   : > { %v834_v17 = vsel %vm597_vm5, %v1909_v16, %v1910_v15  ;;  %v846_v18 = vsel %vm610_vm4, %v1914_v14, %v1915_v13 }
 0x24b   : > { %v920_v20 = vpack.c.bf16 %v846_v18, %v834_v17  ;;  %v798_v36 = vsel %vm558_vm8, %v1929_v24, %v1930_v23 }
 0x24c   : > { %v914_v39 = vpack.c.bf16 %v798_v36, %v2500_v42  ;;  %v1057_v36 = vld [vmem:[#allocation7 + $0x158] sm:$0xff] }
 0x24d   : > { %953 = vmatpush.bf16.msra.mxu3 %v920_v20 }
 0x24f   : > { %v1918_v25 = vpop.permute.xlu1 %1917  ;;  %v868_v26 = vpop.permute.xlu0 %867 }
 0x250   : > { %v1920_v29 = vunpack.i.h.bf16 %v1918_v25  ;;  %v1919_v30 = vunpack.i.l.bf16 %v1918_v25  ;;  %v869_v31 = vsel %vm636_vm2, %v1905_v63, %v868_v26  ;;  %v871_v0 = vsel %vm636_vm2, %v868_v26, %v1904_v2  ;;  %v796_v42 = vpop.permute.xlu2 %795  ;;  %v1045_v25 = vld [vmem:[#allocation7 + $0xf8] sm:$0xff] }
 0x251   : > { %v924_v3 = vpack.c.bf16 %v869_v31, %v857_v27  ;;  %v925_v32 = vpack.c.bf16 %v871_v0, %v859_v28  ;;  %v797_v58 = vsel %vm558_vm8, %v1930_v23, %v796_v42  ;;  %v799_v59 = vsel %vm558_vm8, %v796_v42, %v1929_v24  ;;  %v1029_v24 = vld [vmem:[#allocation7 + $0x78] sm:$0xff]  ;;  %v1028_v27 = vld [vmem:[#allocation7 + $0x70] sm:$0xff]  ;;  %v1043_v31 = vld [vmem:[#allocation7 + $0xe8] sm:$0xff] }
 0x252   : > { %v810_v33 = vsel %vm571_vm7, %v1919_v30, %v1920_v29  ;;  %v915_v60 = vpack.c.bf16 %v797_v58, %v2498_v40  ;;  %v916_v61 = vpack.c.bf16 %v799_v59, %v2507_v46  ;;  %v1061_v26 = vld [vmem:[#allocation7 + $0x178] sm:$0xff]  ;;  %1062 = vmatpush.msrb.mxu2 %v1029_v24  ;;  %v1044_v28 = vld [vmem:[#allocation7 + $0xf0] sm:$0xff]  ;;  %v1059_v0 = vld [vmem:[#allocation7 + $0x168] sm:$0xff] }
 0x253   : > { %965 = vmatpush.bf16.msrb.mxu0 %v924_v3  ;;  %978 = vmatpush.bf16.msrb.mxu1 %v925_v32  ;;  %v917_v35 = vpack.c.bf16 %v822_v34, %v810_v33  ;;  %v1026_v3 = vld [vmem:[#allocation7 + $0x60] sm:$0xff]  ;;  %v1025_v34 = vld [vmem:[#allocation7 + $0x58] sm:$0xff] }
 0x254   : > { %1063 = vmatpush.msrb.mxu2 %v1028_v27  ;;  %v1042_v32 = vld [vmem:[#allocation7 + $0xe0] sm:$0xff]  ;;  %v1037_v42 = vld [vmem:[#allocation7 + $0xb8] sm:$0xff] }
 0x255   : > { %954 = vmatpush.bf16.msra.mxu3 %v917_v35  ;;  %v1058_v33 = vld [vmem:[#allocation7 + $0x160] sm:$0xff]  ;;  %v1041_v35 = vld [vmem:[#allocation7 + $0xd8] sm:$0xff] }
 0x256   : > { %v1034_v58 = vld [vmem:[#allocation7 + $0xa0] sm:$0xff] }
 0x257   : > { %v844_v37 = vpop.permute.xlu1 %843  ;;  %v832_v38 = vpop.permute.xlu0 %831  ;;  %v1050_v59 = vld [vmem:[#allocation7 + $0x120] sm:$0xff] }
 0x258   : > { %v845_v41 = vsel %vm610_vm4, %v1915_v13, %v844_v37  ;;  %v847_v43 = vsel %vm610_vm4, %v844_v37, %v1914_v14  ;;  %v833_v44 = vsel %vm597_vm5, %v1910_v15, %v832_v38  ;;  %v835_v45 = vsel %vm597_vm5, %v832_v38, %v1909_v16  ;;  %v1024_v37 = vld [vmem:[#allocation7 + $0x50] sm:$0xff] }
 0x259   : > { %955 = vmatpush.bf16.msra.mxu3 %v914_v39  ;;  %v921_v47 = vpack.c.bf16 %v845_v41, %v833_v44  ;;  %v922_v48 = vpack.c.bf16 %v847_v43, %v835_v45  ;;  %v1040_v38 = vld [vmem:[#allocation7 + $0xd0] sm:$0xff]  ;;  %v1023_v41 = vld [vmem:[#allocation7 + $0x48] sm:$0xff]  ;;  %v1022_v45 = vld [vmem:[#allocation7 + $0x40] sm:$0xff] }
 0x25a   : > { %v1056_v39 = vld [vmem:[#allocation7 + $0x150] sm:$0xff]  ;;  %v1039_v43 = vld [vmem:[#allocation7 + $0xc8] sm:$0xff] }
 0x25b   : > { %966 = vmatpush.bf16.msrb.mxu0 %v921_v47  ;;  %979 = vmatpush.bf16.msrb.mxu1 %v922_v48  ;;  %v1055_v44 = vld [vmem:[#allocation7 + $0x148] sm:$0xff]  ;;  %v1038_v47 = vld [vmem:[#allocation7 + $0xc0] sm:$0xff] }
 0x25c   : > { %1706 = vmatmul.msk.bf16.vlgmr.msra.gmra.mxu3 %vm705_vm9, %v929_v49  ;;  %v1054_v48 = vld [vmem:[#allocation7 + $0x140] sm:$0xff] }
 0x25d   : > { %1082 = vmatpush.msrb.mxu3 %v1045_v25 }
 0x25f   : > { %v820_v50 = vpop.permute.xlu1 %819  ;;  %v808_v51 = vpop.permute.xlu0 %807  ;;  %1083 = vmatpush.msrb.mxu3 %v1044_v28 }
 0x260   : > { %v821_v52 = vsel %vm584_vm6, %v1925_v22, %v820_v50  ;;  %v823_v53 = vsel %vm584_vm6, %v820_v50, %v1924_v1  ;;  %v809_v54 = vsel %vm571_vm7, %v1920_v29, %v808_v51  ;;  %v811_v55 = vsel %vm571_vm7, %v808_v51, %v1919_v30  ;;  %v1060_v29 = vld [vmem:[#allocation7 + $0x170] sm:$0xff]  ;;  %v1027_v30 = vld [vmem:[#allocation7 + $0x68] sm:$0xff]  ;;  %v1053_v50 = vld [vmem:[#allocation7 + $0x138] sm:$0xff] }
 0x261   : > { %v918_v56 = vpack.c.bf16 %v821_v52, %v809_v54  ;;  %v919_v57 = vpack.c.bf16 %v823_v53, %v811_v55  ;;  %1064 = vmatpush.msrb.mxu2 %v1027_v30  ;;  %1084 = vmatpush.msrb.mxu3 %v1043_v31  ;;  %v1020_v51 = vld [vmem:[#allocation7 + $0x30] sm:$0xff]  ;;  %v1019_v54 = vld [vmem:[#allocation7 + $0x28] sm:$0xff] }
 0x262   : > { %v1036_v52 = vld [vmem:[#allocation7 + $0xb0] sm:$0xff]  ;;  %v1035_v55 = vld [vmem:[#allocation7 + $0xa8] sm:$0xff] }
 0x263   : > { %967 = vmatpush.bf16.msrb.mxu0 %v918_v56  ;;  %980 = vmatpush.bf16.msrb.mxu1 %v919_v57  ;;  %v1052_v53 = vld [vmem:[#allocation7 + $0x130] sm:$0xff]  ;;  %v1051_v56 = vld [vmem:[#allocation7 + $0x128] sm:$0xff]  ;;  %v1018_v57 = vld [vmem:[#allocation7 + $0x20] sm:$0xff] }
 0x264   : > { %1065 = vmatpush.msrb.mxu2 %v1026_v3  ;;  %1085 = vmatpush.msrb.mxu3 %v1042_v32 }
 0x266   : > { %1066 = vmatpush.msrb.mxu2 %v1025_v34  ;;  %1086 = vmatpush.msrb.mxu3 %v1041_v35 }
 0x267   : > { %968 = vmatpush.bf16.msrb.mxu0 %v915_v60  ;;  %981 = vmatpush.bf16.msrb.mxu1 %v916_v61  ;;  %v934_v63 = vpop.permute.xlu0 %933  ;;  %v1017_v60 = vld [vmem:[#allocation7 + $0x18] sm:$0xff] }
 0x268   : > { %1067 = vmatpush.msrb.mxu2 %v1024_v37  ;;  %1087 = vmatpush.msrb.mxu3 %v1040_v38  ;;  %v1033_v61 = vld [vmem:[#allocation7 + $0x98] sm:$0xff]  ;;  %v1746_v37 = vld [vmem:[%s2743_s5] sm:$0xff] }
 0x26a   : > { %1707 = vmatmul.msk.bf16.vlgmr.msrb.gmra.mxu0 %vm705_vm9, %v929_v49  ;;  %1708 = vmatmul.msk.bf16.vlgmr.msrb.gmra.mxu1 %vm705_vm9, %v929_v49  ;;  %v1021_v49 = vld [vmem:[#allocation7 + $0x38] sm:$0xff] }
 0x26b   : > { %1102 = vmatpush.msra.mxu0 %v1061_v26  ;;  %1068 = vmatpush.msrb.mxu2 %v1023_v41 }
 0x26c   : > { %1088 = vmatpush.msrb.mxu3 %v1039_v43 }
 0x26d   : > { %1103 = vmatpush.msra.mxu0 %v1060_v29  ;;  %1069 = vmatpush.msrb.mxu2 %v1022_v45 }
 0x26e   : > { %1089 = vmatpush.msrb.mxu3 %v1038_v47 }
 0x26f   : > { %1104 = vmatpush.msra.mxu0 %v1059_v0  ;;  %1070 = vmatpush.msrb.mxu2 %v1021_v49  ;;  %v2023_v49 = vld [vmem:[%s2750_s12] ss:$0 sm:$0xff] }
 0x270   : > { %1090 = vmatpush.msrb.mxu3 %v1037_v42 }
 0x271   : > { %1105 = vmatpush.msra.mxu0 %v1058_v33  ;;  %1071 = vmatpush.msrb.mxu2 %v1020_v51 }
 0x272   : > { %1091 = vmatpush.msrb.mxu3 %v1036_v52 }
 0x273   : > { %1106 = vmatpush.msra.mxu0 %v1057_v36  ;;  %1072 = vmatpush.msrb.mxu2 %v1019_v54 }
 0x274   : > { %1092 = vmatpush.msrb.mxu3 %v1035_v55  ;;  %v1297_v55 = vld [vmem:[%s2746_s8] sm:$0xff] }
 0x275   : > { %1107 = vmatpush.msra.mxu0 %v1056_v39  ;;  %1073 = vmatpush.msrb.mxu2 %v1018_v57 }
 0x276   : > { %1093 = vmatpush.msrb.mxu3 %v1034_v58 }
 0x277   : > { %1108 = vmatpush.msra.mxu0 %v1055_v44  ;;  %1074 = vmatpush.msrb.mxu2 %v1017_v60 }
 0x278   : > { %1094 = vmatpush.msrb.mxu3 %v1033_v61 }
 0x279   : > { %1109 = vmatpush.msra.mxu0 %v1054_v48 }
 0x27b   : > { %1110 = vmatpush.msra.mxu0 %v1053_v50 }
 0x27d   : > { %1111 = vmatpush.msra.mxu0 %v1052_v53 }
 0x27f   : > { %1112 = vmatpush.msra.mxu0 %v1051_v56  ;;  %v1298_v56 = vld [vmem:[%s2746_s8 + $0x8] sm:$0xff] }
 0x281   : > { %1113 = vmatpush.msra.mxu0 %v1050_v59 }
 0x2df   : > { %v957_v62 = vpop.f32.mrf.mxu3 }
 0x2e0   : > { %v958_v2 = vadd.f32 %v957_v62, %v934_v63  ;;  %v1049_v62 = vld [vmem:[#allocation7 + $0x118] sm:$0xff] }
 0x2e1   : > { %1114 = vmatpush.msra.mxu0 %v1049_v62 }
 0x2e2   : > { %v987_v7 = vmax.f32 %v958_v2, 0.0  ;;  %v1032_v2 = vld [vmem:[#allocation7 + $0x90] sm:$0xff] }
 0x2e3   : > { %1095 = vmatpush.msrb.mxu3 %v1032_v2 }
 0x2e7   : > { %v959_v4 = vpop.f32.mrf.mxu3  ;;  %v970_v5 = vpop.f32.mrf.mxu0 }
 0x2e8   : > { %v971_v8 = vadd.f32 %v970_v5, %v934_v63  ;;  %v983_v9 = vpop.f32.mrf.mxu1  ;;  %v1048_v4 = vld [vmem:[#allocation7 + $0x110] sm:$0xff]  ;;  %v1015_v5 = vld [vmem:[#allocation7 + $0x8] sm:$0xff] }
 0x2e9   : > { %v984_v10 = vadd.f32 %v983_v9, %v934_v63  ;;  %v1016_v63 = vld [vmem:[#allocation7 + $0x10] sm:$0xff]  ;;  %1115 = vmatpush.msra.mxu0 %v1048_v4  ;;  %v1014_v9 = vld [vmem:[#allocation7] sm:$0xff] }
 0x2ea   : > { %v988_v11 = vmax.f32 %v971_v8, 0.0  ;;  %1075 = vmatpush.msrb.mxu2 %v1016_v63  ;;  %v1047_v8 = vld [vmem:[#allocation7 + $0x108] sm:$0xff] }
 0x2eb   : > { %v989_v12 = vmax.f32 %v984_v10, 0.0  ;;  %v1030_v10 = vld [vmem:[#allocation7 + $0x80] sm:$0xff]  ;;  %1116 = vmatpush.msra.mxu0 %v1047_v8 }
 0x2ec   : > { %v1932_v40 = vpack.i.bf16 %v988_v11, %v987_v7  ;;  %1076 = vmatpush.msrb.mxu2 %v1015_v5 }
 0x2ed   : > { %994 = vrot.lane.b32.xlu2 %v989_v12, %s2198_s17 }
 0x2ee   : > { %1933 = vrot.lane.b32.xlu1 %v1932_v40, %s2198_s17  ;;  %1077 = vmatpush.msrb.mxu2 %v1014_v9 }
 0x2ef   : > { %v972_v46 = vpop.f32.mrf.mxu0 }
 0x2f0   : > { %v985_v13 = vpop.f32.mrf.mxu1 }
 0x347   : > { %v995_v17 = vpop.permute.xlu2 %994 }
 0x360   : > { %v1934_v14 = vpop.permute.xlu1 %1933 }
 0x361   : > { %v1936_v15 = vunpack.i.h.bf16 %v1934_v14  ;;  %v1935_v16 = vunpack.i.l.bf16 %v1934_v14 }
 0x363   : > { %v996_v18 = vsel %vm558_vm8, %v1936_v15, %v995_v17  ;;  %v997_v19 = vsel %vm558_vm8, %v1935_v16, %v1936_v15  ;;  %v998_v20 = vsel %vm558_vm8, %v995_v17, %v1935_v16 }
 0x364   : > { %v2601_v21 = vmax.f32 %v989_v12, %v998_v20  ;;  %v2603_v22 = vmax.f32 %v987_v7, %v997_v19  ;;  %v2605_v1 = vmax.f32 %v988_v11, %v996_v18  ;;  %v1031_v7 = vld [vmem:[#allocation7 + $0x88] sm:$0xff]  ;;  %v1046_v11 = vld [vmem:[#allocation7 + $0x100] sm:$0xff] }
 0x365   : > { %1096 = vmatpush.msrb.mxu3 %v1031_v7  ;;  %1117 = vmatpush.msra.mxu0 %v1046_v11 }
 0x366   : > { %1006 = vrot.lane.b32.xlu2 %v2601_v21, %s2197_s16  ;;  %v1937_v23 = vpack.i.bf16 %v2605_v1, %v2603_v22 }
 0x367   : > { %1097 = vmatpush.msrb.mxu3 %v1030_v10 }
 0x368   : > { %1938 = vrot.lane.b32.xlu1 %v1937_v23, %s2197_s16  ;;  %s2201_s16 = smov 107  }
 0x3c0   : > { %v1007_v13 = vpop.permute.xlu2 %1006 }
 0x3da   : > { %v1939_v12 = vpop.permute.xlu1 %1938 }
 0x3db   : > { %v1941_v40 = vunpack.i.h.bf16 %v1939_v12  ;;  %v1940_v46 = vunpack.i.l.bf16 %v1939_v12 }
 0x3dd   : > { %v1010_v14 = vsel %vm584_vm6, %v1007_v13, %v1940_v46  ;;  %v1009_v15 = vsel %vm584_vm6, %v1940_v46, %v1941_v40  ;;  %v1008_v16 = vsel %vm584_vm6, %v1941_v40, %v1007_v13 }
 0x3de   : > { %v1013_v17 = vmax.f32 %v2601_v21, %v1010_v14  ;;  %v1011_v18 = vmax.f32 %v2603_v22, %v1009_v15  ;;  %v1012_v19 = vmax.f32 %v2605_v1, %v1008_v16  ;;  %v1165_v21 = vld [vmem:[%s2744_s6] sm:$0xff] }
 0x3e0   : > { %1078 = vmatmul.f32.vlgmr.msrb.gmra.mxu2 %v1011_v18  ;;  %1098 = vmatmul.f32.vlgmr.msrb.gmra.mxu3 %v1012_v19 }
 0x3e1   : > { %1118 = vmatmul.f32.vlgmr.msra.gmra.mxu0 %v1013_v17 }
 0x45e   : > { %v1119_v25 = vpop.f32.mrf.mxu0 }
 0x463   : > { %v1079_v20 = vpop.f32.mrf.mxu2  ;;  %v1099_v23 = vpop.f32.mrf.mxu3 }
 0x464   : > { %v1100_v24 = vadd.f32 %v1099_v23, %v1079_v20 }
 0x466   : > { %v1120_v26 = vadd.f32 %v1119_v25, %v1100_v24 }
 0x468   : > { %1143 = vrot.lane.b32.xlu2 %v1120_v26, %s2201_s16  ;;  %1140 = vrot.lane.b32.xlu1 %v1120_v26, %s2195_s30 }
 0x469   : > { %1146 = vrot.lane.b32.xlu0 %v1120_v26, %s2202_s25 }
 0x470   : > { %1128 = vrot.lane.b32.xlu2 %v1120_v26, %s2196_s23  ;;  %1137 = vrot.lane.b32.xlu1 %v1120_v26, %s2203_s26 }
 0x471   : > { %1134 = vrot.lane.b32.xlu0 %v1120_v26, %s2204_s13 }
 0x478   : > { %1125 = vrot.lane.b32.xlu1 %v1120_v26, %s2198_s17  ;;  %1169 = vperm.xlu2 %1942, %v1165_v21   ;;  %v1716_v21 = vld [vmem:[%s2745_s7] sm:$0xf] }
 0x479   : > { %1131 = vrot.lane.b32.xlu0 %v1120_v26, %s2205_s9 }
 0x481   : > { %1174 = vperm.xlu0 %1931, %v1166_v6  }
 0x4c2   : > { %v1144_v29 = vpop.permute.xlu2 %1143 }
 0x4ca   : > { %v1129_v32 = vpop.permute.xlu2 %1128 }
 0x4d2   : > { %v1170_v38 = vpop.permute.xlu2 %1169 }
 0x4da   : > { %v1141_v22 = vpop.permute.xlu1 %1140 }
 0x4db   : > { %v1147_v1 = vpop.permute.xlu0 %1146  ;;  %v1161_v30 = vpack.c.bf16 %v1144_v29, %v1141_v22  ;;  %v1748_v22 = vld [vmem:[%s2745_s7 + $0x4] sm:$0xf0]  ;;  %v1718_v29 = vld [vmem:[%s2745_s7 + $0x8] sm:$0xf0] }
 0x4dc   : > { %v1162_v27 = vpack.c.bf16 %v1147_v1, %v1147_v1 }
 0x4de   : > { %v1186_v28 = vsel %vm709_vm1, %v1162_v27, 0  ;;  %v1717_v27 = vor.u32 %v1748_v22, %v1716_v21 }
 0x4df   : > { %1191 = vmatpush.bf16.msra.mxu1 %v1186_v28  ;;  %v1747_v28 = vld [vmem:[%s2745_s7 + $0x4] sm:$0xf] }
 0x4e2   : > { %v1138_v31 = vpop.permute.xlu1 %1137 }
 0x4e3   : > { %1192 = vmatpush.bf16.msra.mxu1 %v1161_v30  ;;  %v1135_v0 = vpop.permute.xlu0 %1134  ;;  %v1721_v30 = vor.u32 %v1747_v28, %v1718_v29 }
 0x4e4   : > { %v1160_v3 = vpack.c.bf16 %v1138_v31, %v1135_v0 }
 0x4e7   : > { %1193 = vmatpush.bf16.msra.mxu1 %v1160_v3 }
 0x4ea   : > { %v1126_v35 = vpop.permute.xlu1 %1125 }
 0x4eb   : > { %v1132_v33 = vpop.permute.xlu0 %1131  ;;  %v1158_v36 = vpack.c.bf16 %v1126_v35, %v1120_v26 }
 0x4ec   : > { %v1159_v34 = vpack.c.bf16 %v1132_v33, %v1129_v32 }
 0x4ee   : > { %1194 = vmatpush.bf16.msra.mxu1 %v1159_v34 }
 0x4f2   : > { %1195 = vmatpush.bf16.msra.mxu1 %v1158_v36 }
 0x4f3   : > { %v1175_v44 = vpop.permute.xlu0 %1174 }
 0x4f5   : > { %1713 = vmatmul.msk.bf16.vlgmr.msra.gmra.mxu1 %vm705_vm9, %v1746_v37 }
 0x572   : > { %v1197_v39 = vpop.f32.mrf.mxu1 }
 0x573   : > { %v1198_v41 = vadd.f32 %v1197_v39, %v1170_v38 }
 0x575   : > { %v1202_v43 = vmax.f32 %v1198_v41, 0.0 }
 0x577   : > { %1204 = vrot.lane.b32.xlu1 %v1202_v43, %s2206_s29  ;;  %v1379_v43 = vld [vmem:[#allocation9 + $0x78] sm:$0xff] }
 0x578   : > { %1380 = vmatpush.msrb.mxu1 %v1379_v43 }
 0x57a   : > { %v1199_v45 = vpop.f32.mrf.mxu1 }
 0x57b   : > { %v1200_v47 = vadd.f32 %v1199_v45, %v1175_v44  ;;  %v1378_v44 = vld [vmem:[#allocation9 + $0x70] sm:$0xff]  ;;  %v1377_v45 = vld [vmem:[#allocation9 + $0x68] sm:$0xff] }
 0x57c   : > { %1381 = vmatpush.msrb.mxu1 %v1378_v44 }
 0x57d   : > { %v1203_v48 = vmax.f32 %v1200_v47, 0.0  ;;  %v1376_v47 = vld [vmem:[#allocation9 + $0x60] sm:$0xff] }
 0x57e   : > { %1382 = vmatpush.msrb.mxu1 %v1377_v45 }
 0x57f   : > { %1206 = vrot.lane.b32.xlu2 %v1203_v48, %s2206_s29  ;;  %v1375_v48 = vld [vmem:[#allocation9 + $0x58] sm:$0xff] }
 0x580   : > { %1383 = vmatpush.msrb.mxu1 %v1376_v47  ;;  %v1725_v47 = vld [vmem:[#allocation4] sm:$0xf] }
 0x582   : > { %1384 = vmatpush.msrb.mxu1 %v1375_v48  ;;  %v1750_v48 = vld [vmem:[#allocation4 + $0x4] sm:$0xf0] }
 0x5d9   : > { %v1207_v42 = vpop.permute.xlu2 %1206 }
 0x5da   : > { %v1213_v51 = vmul.f32 %v2023_v49, %v1207_v42  ;;  %v1373_v42 = vld [vmem:[#allocation9 + $0x48] sm:$0xff] }
 0x5e9   : > { %v1205_v50 = vpop.permute.xlu1 %1204 }
 0x5ea   : > { %v1212_v52 = vmul.f32 %v2023_v49, %v1205_v50  ;;  %v1374_v49 = vld [vmem:[#allocation9 + $0x50] sm:$0xff] }
 0x5eb   : > { %1385 = vmatpush.msrb.mxu1 %v1374_v49  ;;  %v1726_v49 = vor.u32 %v1750_v48, %v1725_v47 }
 0x5ec   : > { %v1953_v53 = vpack.i.bf16 %v1213_v51, %v1212_v52  ;;  %v1286_v54 = vpack.c.bf16 %v1213_v51, %v1212_v52 }
 0x5ed   : > { %1386 = vmatpush.msrb.mxu1 %v1373_v42  ;;  %v1751_v42 = vld [vmem:[#allocation4 + $0x14] sm:$0xf] }
 0x5ee   : > { %1954 = vrot.lane.b32.xlu2 %v1953_v53, %s2203_s26  ;;  %1949 = vrot.lane.b32.xlu1 %v1953_v53, %s2195_s30  ;;  %s2210_s30 = smov 121  }
 0x5ef   : > { %1944 = vrot.lane.b32.xlu0 %v1953_v53, %s2201_s16 }
 0x5f6   : > { %1969 = vrot.lane.b32.xlu2 %v1953_v53, %s2196_s23  ;;  %1964 = vrot.lane.b32.xlu1 %v1953_v53, %s2205_s9 }
 0x5f7   : > { %1959 = vrot.lane.b32.xlu0 %v1953_v53, %s2204_s13  ;;  %s2211_s13 = smov 114  }
 0x5fe   : > { %1301 = vperm.xlu2 %1942, %v1297_v55   ;;  %1979 = vrot.lane.b32.xlu1 %v1953_v53, %s2202_s25  ;;  %v1371_v55 = vld [vmem:[#allocation9 + $0x38] sm:$0xff] }
 0x5ff   : > { %1974 = vrot.lane.b32.xlu0 %v1953_v53, %s2198_s17 }
 0x607   : > { %1306 = vperm.xlu0 %1931, %v1298_v56   ;;  %v1370_v56 = vld [vmem:[#allocation9 + $0x30] sm:$0xff] }
 0x648   : > { %v1955_v2 = vpop.permute.xlu2 %1954 }
 0x649   : > { %v1957_v4 = vunpack.i.h.bf16 %v1955_v2  ;;  %v1956_v5 = vunpack.i.l.bf16 %v1955_v2 }
 0x64b   : > { %v1291_v9 = vpack.c.bf16 %v1957_v4, %v1956_v5 }
 0x650   : > { %v1970_v14 = vpop.permute.xlu2 %1969 }
 0x651   : > { %v1972_v15 = vunpack.i.h.bf16 %v1970_v14  ;;  %v1971_v16 = vunpack.i.l.bf16 %v1970_v14 }
 0x653   : > { %v1288_v19 = vpack.c.bf16 %v1972_v15, %v1971_v16 }
 0x658   : > { %v1302_v3 = vpop.permute.xlu2 %1301 }
 0x660   : > { %v1950_v57 = vpop.permute.xlu1 %1949 }
 0x661   : > { %v1945_v58 = vpop.permute.xlu0 %1944  ;;  %v1952_v61 = vunpack.i.h.bf16 %v1950_v57  ;;  %v1951_v62 = vunpack.i.l.bf16 %v1950_v57  ;;  %v1369_v57 = vld [vmem:[#allocation9 + $0x28] sm:$0xff] }
 0x662   : > { %v1947_v59 = vunpack.i.h.bf16 %v1945_v58  ;;  %v1946_v60 = vunpack.i.l.bf16 %v1945_v58  ;;  %v1368_v58 = vld [vmem:[#allocation9 + $0x20] sm:$0xff] }
 0x663   : > { %v1292_v7 = vpack.c.bf16 %v1952_v61, %v1951_v62  ;;  %v1365_v61 = vld [vmem:[#allocation9 + $0x8] sm:$0xff]  ;;  %v1364_v62 = vld [vmem:[#allocation9] sm:$0xff] }
 0x664   : > { %v1293_v63 = vpack.c.bf16 %v1947_v59, %v1946_v60  ;;  %v1367_v59 = vld [vmem:[#allocation9 + $0x18] sm:$0xff]  ;;  %v1366_v60 = vld [vmem:[#allocation9 + $0x10] sm:$0xff] }
 0x666   : > { %1322 = vmatpush.bf16.msra.mxu2 %v1293_v63 }
 0x668   : > { %v1965_v12 = vpop.permute.xlu1 %1964 }
 0x669   : > { %v1960_v8 = vpop.permute.xlu0 %1959  ;;  %v1967_v40 = vunpack.i.h.bf16 %v1965_v12  ;;  %v1966_v46 = vunpack.i.l.bf16 %v1965_v12  ;;  %v1491_v12 = vld [vmem:[%s2748_s10 + $0x18] sm:$0xff] }
 0x66a   : > { %1323 = vmatpush.bf16.msra.mxu2 %v1292_v7  ;;  %v1962_v10 = vunpack.i.h.bf16 %v1960_v8  ;;  %v1961_v11 = vunpack.i.l.bf16 %v1960_v8 }
 0x66b   : > { %v1289_v17 = vpack.c.bf16 %v1967_v40, %v1966_v46  ;;  %v1490_v40 = vld [vmem:[%s2748_s10 + $0x10] sm:$0xff]  ;;  %v1489_v46 = vld [vmem:[%s2748_s10 + $0x8] sm:$0xff] }
 0x66c   : > { %v1290_v13 = vpack.c.bf16 %v1962_v10, %v1961_v11  ;;  %v1488_v11 = vld [vmem:[%s2748_s10] sm:$0xff] }
 0x66e   : > { %1324 = vmatpush.bf16.msra.mxu2 %v1291_v9 }
 0x670   : > { %v1980_v24 = vpop.permute.xlu1 %1979 }
 0x671   : > { %v1975_v18 = vpop.permute.xlu0 %1974  ;;  %v1982_v26 = vunpack.i.h.bf16 %v1980_v24  ;;  %v1981_v6 = vunpack.i.l.bf16 %v1980_v24 }
 0x672   : > { %1325 = vmatpush.bf16.msra.mxu2 %v1290_v13  ;;  %v1977_v20 = vunpack.i.h.bf16 %v1975_v18  ;;  %v1976_v23 = vunpack.i.l.bf16 %v1975_v18 }
 0x673   : > { %v1294_v1 = vpack.c.bf16 %v1982_v26, %v1981_v6 }
 0x674   : > { %v1287_v25 = vpack.c.bf16 %v1977_v20, %v1976_v23 }
 0x676   : > { %1326 = vmatpush.bf16.msra.mxu2 %v1289_v17 }
 0x679   : > { %v1307_v36 = vpop.permute.xlu0 %1306 }
 0x67a   : > { %1327 = vmatpush.bf16.msra.mxu2 %v1288_v19 }
 0x67e   : > { %1328 = vmatpush.bf16.msra.mxu2 %v1287_v25 }
 0x682   : > { %1329 = vmatpush.bf16.msra.mxu2 %v1286_v54  ;;  %v1372_v54 = vld [vmem:[#allocation9 + $0x40] sm:$0xff] }
 0x683   : > { %1387 = vmatpush.msrb.mxu1 %v1372_v54 }
 0x685   : > { %1330 = vmatmul.bf16.vlgmr.msra.gmra.mxu2 %v1717_v27  ;;  %1388 = vmatpush.msrb.mxu1 %v1371_v55 }
 0x686   : > { %1343 = vmatpush.bf16.msrb.mxu2 %v1294_v1 }
 0x687   : > { %1389 = vmatpush.msrb.mxu1 %v1370_v56 }
 0x689   : > { %1390 = vmatpush.msrb.mxu1 %v1369_v57 }
 0x68b   : > { %1391 = vmatpush.msrb.mxu1 %v1368_v58 }
 0x68d   : > { %1392 = vmatpush.msrb.mxu1 %v1367_v59 }
 0x68f   : > { %1393 = vmatpush.msrb.mxu1 %v1366_v60 }
 0x691   : > { %1394 = vmatpush.msrb.mxu1 %v1365_v61 }
 0x693   : > { %1395 = vmatpush.msrb.mxu1 %v1364_v62 }
 0x695   : > { %1722 = vmatmul.msk.bf16.vlgmr.msrb.gmra.mxu2 %vm1318_vm11, %v1721_v30 }
 0x708   : > { %v1331_v31 = vpop.f32.mrf.mxu2 }
 0x709   : > { %v1332_v32 = vadd.f32 %v1331_v31, %v1302_v3 }
 0x710   : > { %v1333_v0 = vpop.f32.mrf.mxu2 }
 0x711   : > { %v1334_v37 = vadd.f32 %v1333_v0, %v1307_v36  ;;  %v1749_v36 = vld [vmem:[#allocation4 + $0x4] sm:$0xf] }
 0x718   : > { %v1345_v33 = vpop.f32.mrf.mxu2 }
 0x719   : > { %v1346_v34 = vadd.f32 %v1345_v33, %v1332_v32 }
 0x71b   : > { %v1350_v35 = vmax.f32 %v1346_v34, 0.0 }
 0x71d   : > { %1352 = vrot.lane.b32.xlu1 %v1350_v35, %s2198_s17 }
 0x720   : > { %v1347_v38 = vpop.f32.mrf.mxu2 }
 0x721   : > { %v1348_v39 = vadd.f32 %v1347_v38, %v1334_v37  ;;  %v1727_v37 = vld [vmem:[#allocation4 + $0x8] sm:$0xf0] }
 0x722   : > { %v1730_v44 = vor.u32 %v1749_v36, %v1727_v37 }
 0x723   : > { %v1351_v41 = vmax.f32 %v1348_v39, 0.0 }
 0x725   : > { %1354 = vrot.lane.b32.xlu2 %v1351_v41, %s2198_s17 }
 0x77f   : > { %v1355_v50 = vpop.permute.xlu2 %1354 }
 0x780   : > { %v1357_v51 = vmax.f32 %v1351_v41, %v1355_v50  ;;  %v1735_v50 = vld [vmem:[#allocation4 + $0x18] sm:$0xf0] }
 0x782   : > { %1360 = vrot.lane.b32.xlu1 %v1357_v51, %s2205_s9 }
 0x78f   : > { %v1353_v52 = vpop.permute.xlu1 %1352 }
 0x790   : > { %v1356_v53 = vmax.f32 %v1350_v35, %v1353_v52  ;;  %v1733_v52 = vld [vmem:[#allocation4 + $0x10] sm:$0xf] }
 0x792   : > { %1358 = vrot.lane.b32.xlu0 %v1356_v53, %s2205_s9  ;;  %s2207_s9 = smov 120  }
 0x7f4   : > { %v1361_v4 = vpop.permute.xlu1 %1360 }
 0x7f5   : > { %v1363_v5 = vmax.f32 %v1357_v51, %v1361_v4  ;;  %v1738_v51 = vor.u32 %v1751_v42, %v1735_v50 }
 0x804   : > { %v1359_v63 = vpop.permute.xlu0 %1358 }
 0x805   : > { %v1362_v2 = vmax.f32 %v1356_v53, %v1359_v63  ;;  %v1752_v53 = vld [vmem:[#allocation4 + $0x14] sm:$0xf0] }
 0x806   : > { %v1734_v54 = vor.u32 %v1752_v53, %v1733_v52 }
 0x807   : > { %1396 = vmatmul.f32.vlgmr.msrb.gmra.mxu1 %v1362_v2 }
 0x80f   : > { %1399 = vmatmul.f32.gmra.mxu1 %v1363_v5 }
 0x884   : > { %v2674_v7 = vpop.f32.mrf.mxu1 }
 0x88c   : > { %v2676_v8 = vpop.f32.mrf.mxu1 }
 0x88d   : > { %v1993_v9 = vpack.i.bf16 %v2676_v8, %v2674_v7  ;;  %v1475_v10 = vpack.c.bf16 %v2676_v8, %v2674_v7 }
 0x88f   : > { %1994 = vrot.lane.b32.xlu1 %v1993_v9, %s2207_s9  ;;  %1989 = vrot.lane.b32.xlu0 %v1993_v9, %s2203_s26 }
 0x890   : > { %1984 = vrot.lane.b32.xlu2 %v1993_v9, %s2208_s24  ;;  %s1753_s24 = sshll.u32 %s2315_s22, 5 }
 0x891   : > { %s1594_s16 = scalar_lea.hbm %s2753_s15, %s1753_s24 }
 0x892   : > { %s1597_s26 = sshll.u32 %s1594_s16, 4  ;;  %s1598_s26 = int_to_ptr.hbm [resolvable:$true] %s1597_s26 }
 0x893   : > { %s2128_s28 = sshra.s32 %s1598_s26, 4  ;;  %s2129_s28 = int_to_ptr.hbm [resolvable:$true] %s2128_s28 }
 0x894   : > { %s2130_s29 = scalar_lea.hbm %s2129_s28, 32  ;;  %p2135_p3 = scmp.lt.s32.totalorder %s2129_s28, %s2753_s15 }
 0x895   : > { %p2131_p0 = scmp.ne.s32.totalorder %s2129_s28, %s2130_s29  ;;  %p2136_p4 = scmp.lt.s32.totalorder %s2134_s20, %s2130_s29 }
 0x897   : > { %2009 = vrot.lane.b32.xlu1 %v1993_v9, %s2196_s23  ;;  %2004 = vrot.lane.b32.xlu0 %v1993_v9, %s2209_s27  ;;  %p2132_p1 = pnand %p2131_p0, %p2332_p5  ;;  %p2137_p7 = por %p2136_p4, %p2135_p3 }
 0x898   : > { %1999 = vrot.lane.b32.xlu2 %v1993_v9, %s2210_s30 }
 0x899   : > { %p2133_p2 = pneg %p2132_p1 }
 0x89b   : > { %p2138_p8 = pnand %p2137_p7, %p2133_p2 }
 0x89f   : > { %1494 = vperm.xlu1 %1890, %v1488_v11   ;;  %2019 = vrot.lane.b32.xlu0 %v1993_v9, %s2211_s13 }
 0x8a0   : > { %2014 = vrot.lane.b32.xlu2 %v1993_v9, %s2198_s17  ;;  %s535_s17 = sand.u32 1, %s2176_s19  }
 0x8a1   : > { %s1701_s21 = sshll.u32 %s535_s17, 5  ;;  %s1583_s22 = scalar_lea.sflag [#allocation6], %s535_s17 }
 0x8a2   : > { %s537_s9 = scalar_lea.vmem [#allocation10], %s1701_s21 }
 0x8a3   : > { %s1595_s13 = sshll.u32 %s537_s9, 4  ;;  %s1596_s13 = int_to_ptr.vmem [resolvable:$true] %s1595_s13 }
 0x8a7   : > { %1509 = vperm.xlu1 %1890, %v1491_v12   ;;  %1504 = vperm.xlu0 %1931, %v1490_v40  }
 0x8a8   : > { %1499 = vperm.xlu2 %1942, %v1489_v46  }
 0x8ea   : > { %v1985_v13 = vpop.permute.xlu2 %1984 }
 0x8eb   : > { %v1987_v14 = vunpack.i.h.bf16 %v1985_v13  ;;  %v1986_v15 = vunpack.i.l.bf16 %v1985_v13 }
 0x8ed   : > { %v1482_v16 = vpack.c.bf16 %v1987_v14, %v1986_v15 }
 0x8ef   : > { %1536 = vmatpush.bf16.msra.mxu3 %v1482_v16 }
 0x8f2   : > { %v2000_v26 = vpop.permute.xlu2 %1999 }
 0x8f3   : > { %v2002_v6 = vunpack.i.h.bf16 %v2000_v26  ;;  %v2001_v21 = vunpack.i.l.bf16 %v2000_v26 }
 0x8f5   : > { %v1479_v27 = vpack.c.bf16 %v2002_v6, %v2001_v21 }
 0x8fa   : > { %v2015_v32 = vpop.permute.xlu2 %2014 }
 0x8fb   : > { %v2017_v38 = vunpack.i.h.bf16 %v2015_v32  ;;  %v2016_v39 = vunpack.i.l.bf16 %v2015_v32 }
 0x8fd   : > { %v1476_v45 = vpack.c.bf16 %v2017_v38, %v2016_v39 }
 0x901   : > { %v1995_v17 = vpop.permute.xlu1 %1994  ;;  %v1990_v18 = vpop.permute.xlu0 %1989 }
 0x902   : > { %v1992_v19 = vunpack.i.h.bf16 %v1990_v18  ;;  %v1991_v20 = vunpack.i.l.bf16 %v1990_v18  ;;  %v1997_v23 = vunpack.i.h.bf16 %v1995_v17  ;;  %v1996_v24 = vunpack.i.l.bf16 %v1995_v17  ;;  %v1500_v62 = vpop.permute.xlu2 %1499 }
 0x904   : > { %v1481_v25 = vpack.c.bf16 %v1992_v19, %v1991_v20  ;;  %v1480_v22 = vpack.c.bf16 %v1997_v23, %v1996_v24 }
 0x906   : > { %1537 = vmatpush.bf16.msra.mxu3 %v1481_v25 }
 0x909   : > { %v2005_v1 = vpop.permute.xlu0 %2004  ;;  %v2010_v30 = vpop.permute.xlu1 %2009 }
 0x90a   : > { %1538 = vmatpush.bf16.msra.mxu3 %v1480_v22  ;;  %v2007_v28 = vunpack.i.h.bf16 %v2005_v1  ;;  %v2006_v29 = vunpack.i.l.bf16 %v2005_v1  ;;  %v2012_v31 = vunpack.i.h.bf16 %v2010_v30  ;;  %v2011_v0 = vunpack.i.l.bf16 %v2010_v30 }
 0x90c   : > { %v1478_v3 = vpack.c.bf16 %v2007_v28, %v2006_v29  ;;  %v1477_v41 = vpack.c.bf16 %v2012_v31, %v2011_v0 }
 0x90e   : > { %1539 = vmatpush.bf16.msra.mxu3 %v1479_v27 }
 0x911   : > { %v2020_v33 = vpop.permute.xlu0 %2019  ;;  %v1495_v56 = vpop.permute.xlu1 %1494 }
 0x912   : > { %v2022_v34 = vunpack.i.h.bf16 %v2020_v33  ;;  %v2021_v35 = vunpack.i.l.bf16 %v2020_v33  ;;  %1540 = vmatpush.bf16.msra.mxu3 %v1478_v3 }
 0x914   : > { %v1483_v43 = vpack.c.bf16 %v2022_v34, %v2021_v35 }
 0x916   : > { %1541 = vmatpush.bf16.msra.mxu3 %v1477_v41  ;;  %1562 = vmatpush.bf16.msrb.mxu0 %v1483_v43 }
 0x919   : > { %1739 = vmatmul.msk.bf16.vlgmr.msrb.gmra.mxu0 %vm1318_vm11, %v1730_v44  ;;  %v1505_v7 = vpop.permute.xlu0 %1504  ;;  %v1510_v40 = vpop.permute.xlu1 %1509 }
 0x91a   : > { %1542 = vmatpush.bf16.msra.mxu3 %v1476_v45 }
 0x91e   : > { %1543 = vmatpush.bf16.msra.mxu3 %v1475_v10 }
 0x921   : > { %1544 = vmatmul.bf16.vlgmr.msra.gmra.mxu3 %v1726_v49 }
 0x929   : > { %1740 = vmatmul.msk.bf16.gmra.mxu0 %vm1318_vm11, %v1738_v51 }
 0x931   : > { %1549 = vmatmul.bf16.gmra.mxu3 %v1734_v54 }
 0x996   : > { %v1564_v55 = vpop.f32.mrf.mxu0 }
 0x99e   : > { %v1566_v61 = vpop.f32.mrf.mxu0 }
 0x9a4   : > { %v1545_v57 = vpop.f32.mrf.mxu3 }
 0x9a5   : > { %v1546_v58 = vadd.f32 %v1545_v57, %v1495_v56 }
 0x9a6   : > { %v1569_v8 = vpop.f32.mrf.mxu0 }
 0x9a7   : > { %v1565_v59 = vadd.f32 %v1564_v55, %v1546_v58 }
 0x9a9   : > { %v1574_v60 = vmax.f32 %v1565_v59, 0.0 }
 0x9ab   : > { %1578 = vst [vmem:[%s537_s9] sm:$0xff] %v1574_v60 }
 0x9ac   : > { %v1547_v63 = vpop.f32.mrf.mxu3 }
 0x9ad   : > { %v1548_v2 = vadd.f32 %v1547_v63, %v1500_v62 }
 0x9ae   : > { %v1571_v14 = vpop.f32.mrf.mxu0 }
 0x9af   : > { %v1567_v4 = vadd.f32 %v1566_v61, %v1548_v2 }
 0x9b1   : > { %v1575_v5 = vmax.f32 %v1567_v4, 0.0 }
 0x9b3   : > { %1579 = vst [vmem:[%s537_s9 + $0x8] sm:$0xff] %v1575_v5 }
 0x9b4   : > { %v1550_v9 = vpop.f32.mrf.mxu3 }
 0x9b5   : > { %v1551_v10 = vadd.f32 %v1550_v9, %v1505_v7 }
 0x9b7   : > { %v1570_v11 = vadd.f32 %v1569_v8, %v1551_v10 }
 0x9b9   : > { %v1576_v12 = vmax.f32 %v1570_v11, 0.0 }
 0x9bb   : > { %1580 = vst [vmem:[%s537_s9 + $0x10] sm:$0xff] %v1576_v12 }
 0x9bc   : > { %v1552_v46 = vpop.f32.mrf.mxu3 }
 0x9bd   : > { %v1553_v13 = vadd.f32 %v1552_v46, %v1510_v40 }
 0x9bf   : > { %v1572_v15 = vadd.f32 %v1571_v14, %v1553_v13 }
 0x9c1   : > { %v1577_v16 = vmax.f32 %v1572_v15, 0.0 }
 0x9c3   : > { %1581 = vst [vmem:[%s537_s9 + $0x18] sm:$0xff] %v1577_v16 }
 0x9c4   : > { %2141 = shalt.err (!%p2138_p8)
}
 0x9c5   : > { %s2212_s17 = smov 128   ;;  %s2213_s9 = smov 8  }
 0x9c6   : > { %1767 = dma.vmem_to_hbm [thread:$0]  (%p2332_p5), %s1596_s13, 512, %s1598_s26, %s1583_s22, %s2212_s17, %s2212_s17, %s2213_s9  }
 0x9c7 PF: > { %s2778_s27 = sld [smem:[#allocation16_spill]] }
 0x9c8   : > { %s2779_s30 = sld [smem:[#allocation14_spill]] }
 0x9cd   : > { %p1789_p9 = scmp.ge.s32.totalorder %s2778_s27, 2 }
 0x9ce   : > { %s1612_s18 = sand.u32 1, %s2779_s30  }
 0x9cf   : > { %p1780_p10 = pnand %p1789_p9, %p2336_p6  ;;  %s1613_s23 = scalar_lea.sflag [#allocation6], %s1612_s18 }
 0x9d1   : > { %p1781_p11 = pneg %p1780_p10 }
 0x9d3   : > { %2167 = dma.done.wait (%p1781_p11), %s1613_s23, 512  }
 0x9d4   : > { %2169 = vsyncadd (%p1781_p11), %s1613_s23, 4294966784  ;;  %s2781_s21 = sld [smem:[#allocation17_spill]]  ;;  %s2784_s18 = smov %s2176_s19 }
 0x9d5   : > { %s2782_s28 = sld [smem:[#allocation15_spill]] }
 0x9d6   : > { %s2783_s20 = sld [smem:[#allocation18_spill]] }
 0x9da   : > { %p27_p12 = scmp.ge.s32.totalorder %s2781_s21, 4  }
 0x9db   : > { %s2785_s19 = smov %s2782_s28 }
 0x9dc   :  { %29 = sbr.rel (!%p27_p12) target bundleno = 8 (0x8), region = 128 }
 0x9e1   :  { %1619 = vsyncpa [#allocation5], 1 }
 0x9e2   :  { %1621 = vsyncpa [#allocation5 + $0x1], 1 }
 0x9e3   :  { %1622 = vsyncpa [#allocation8], 1 }
 0x9e4   :  { %1623 = vsyncpa [#allocation6], 1 }
 0x9e5   :  { %1625 = vsyncpa [#allocation6 + $0x1], 1 }

</bundles_post_ra>
